<compile_context>
chip_gen: v7x
topology: tpu7x:2x2x1
jax: 0.10.0
libtpu: 0.0.40
codegen_flags: <defaults>
</compile_context>

<pallas_src>
import jax
import jax.numpy as jnp
from jax.experimental import pallas as pl
from jax.experimental.pallas import tpu as pltpu


def _round_up(a, m):
    return ((a + m - 1) // m) * m


def ffn_kernel(x_ref, w1_ref, b1_ref, w2_ref, b2_ref, o_ref):
    # x_ref: (block_m, D) input dtype   w1_ref: (D, H) bf16   b1_ref: (1, H) f32
    # w2_ref: (H, D) bf16               b2_ref: (1, D) f32    o_ref: (block_m, D)
    x = x_ref[...]
    x_f32 = x.astype(jnp.float32)

    # First projection: bf16 MXU operands, f32 accumulation; bias+ReLU in f32.
    h = jnp.dot(x.astype(w1_ref.dtype), w1_ref[...],
                preferred_element_type=jnp.float32)
    h = jnp.maximum(h + b1_ref[...], 0.0)

    # Second projection (h downcast to bf16 for the MXU, f32 accumulation).
    y = jnp.dot(h.astype(w2_ref.dtype), w2_ref[...],
                preferred_element_type=jnp.float32)
    y = y + b2_ref[...]

    # Residual connection in f32, cast back to output dtype.
    o_ref[...] = (x_f32 + y).astype(o_ref.dtype)


def ffn_forward(x, w1_t, b1, w2_t, b2, *, mxu_dtype=jnp.bfloat16):
    """x: (B, S, D); w1_t: (D, H); b1: (1, H); w2_t: (H, D); b2: (1, D)."""
    B, S, D = x.shape
    H = w1_t.shape[1]
    M = B * S

    # bf16 weights: halves weight HBM/VMEM traffic and avoids multi-pass f32
    # MXU emulation.  Biases stay f32 (added post-accumulation on the VPU).
    w1_c = w1_t.astype(mxu_dtype)
    w2_c = w2_t.astype(mxu_dtype)
    b1_c = b1.reshape(1, H).astype(jnp.float32)
    b2_c = b2.reshape(1, D).astype(jnp.float32)

    # Row tiling: 256-aligned tiles for large M; otherwise split into >=2 grid
    # steps (v7x megacore).  Pad M so every tile is full.
    if M >= 512:
        block_m = 256
    else:
        block_m = _round_up(max(M // 2, 8), 8)
    m_pad = _round_up(M, block_m)
    grid = (m_pad // block_m,)

    x2 = x.reshape(M, D)
    if m_pad != M:
        x2 = jnp.pad(x2, ((0, m_pad - M), (0, 0)))

    itemsize = jnp.dtype(x.dtype).itemsize
    w_itemsize = jnp.dtype(mxu_dtype).itemsize
    cost = pl.CostEstimate(
        flops=4 * m_pad * D * H,                      # two matmuls
        transcendentals=0,
        bytes_accessed=(2 * m_pad * D * itemsize      # x in + out
                        + 2 * D * H * w_itemsize      # W1 + W2
                        + (H + D) * 4),               # biases
    )

    out = pl.pallas_call(
        ffn_kernel,
        out_shape=jax.ShapeDtypeStruct((m_pad, D), x.dtype),
        grid_spec=pltpu.PrefetchScalarGridSpec(
            num_scalar_prefetch=0,
            grid=grid,
            in_specs=[
                pl.BlockSpec((block_m, D), lambda i: (i, 0)),
                # Weights / biases are grid-invariant and stay VMEM-resident.
                pl.BlockSpec((D, H), lambda i: (0, 0)),
                pl.BlockSpec((1, H), lambda i: (0, 0)),
                pl.BlockSpec((H, D), lambda i: (0, 0)),
                pl.BlockSpec((1, D), lambda i: (0, 0)),
            ],
            out_specs=pl.BlockSpec((block_m, D), lambda i: (i, 0)),
        ),
        compiler_params=pltpu.CompilerParams(
            dimension_semantics=("parallel",),
            # Real working set (double-buffered x/out tiles + bf16 weights +
            # the (block_m, H) f32 intermediate) is a few MiB; 32 MiB leaves
            # ample compiler headroom even on v7x's 64 MiB/TC VMEM.
            vmem_limit_bytes=32 * 1024 * 1024,
        ),
        cost_estimate=cost,
    )(x2, w1_c, b1_c, w2_c, b2_c)

    return out[:M].reshape(B, S, D)


def ffn_reference(x, w1_t, b1, w2_t, b2):
    """Plain-JAX f32 reference mirroring the PyTorch forward."""
    h = jnp.maximum(x @ w1_t + b1[0], 0.0)
    return x + (h @ w2_t + b2[0])


if __name__ == "__main__":
    # Shapes consistent with the module config: embed_dim=256, ff_multiply=4.
    B, S, D = 2, 8, 256
    H = 4 * D

    key = jax.random.PRNGKey(0)
    k_x, k_w1, k_b1, k_w2, k_b2 = jax.random.split(key, 5)

    x = jax.random.normal(k_x, (B, S, D), dtype=jnp.float32)

    # PyTorch-Linear-style uniform init (bound = 1/sqrt(fan_in)), deterministic.
    bound1 = 1.0 / (D ** 0.5)
    bound2 = 1.0 / (H ** 0.5)
    w1_t = jax.random.uniform(k_w1, (D, H), jnp.float32, -bound1, bound1)
    b1 = jax.random.uniform(k_b1, (1, H), jnp.float32, -bound1, bound1)
    w2_t = jax.random.uniform(k_w2, (H, D), jnp.float32, -bound2, bound2)
    b2 = jax.random.uniform(k_b2, (1, D), jnp.float32, -bound2, bound2)

    out = ffn_forward(x, w1_t, b1, w2_t, b2)
    out = jax.block_until_ready(out)

    ref = ffn_reference(x, w1_t, b1, w2_t, b2)
    assert out.shape == (B, S, D)
    # Kernel uses bf16 MXU operands (f32 accumulation), so compare against the
    # pure-f32 reference with a bf16-appropriate tolerance.
    assert jnp.allclose(out, ref, atol=2e-2, rtol=2e-2), "mismatch vs reference"

    print("KERNEL_OK")
</pallas_src>

<mosaic_0001>
module attributes {stable_mosaic.version = 11 : i64} {
  func.func @ffn_kernel(%arg0: i32, %arg1: memref<8x256xf32, #tpu.memory_space<vmem>>, %arg2: memref<256x1024xbf16, #tpu.memory_space<vmem>>, %arg3: memref<1x1024xf32, #tpu.memory_space<vmem>>, %arg4: memref<1024x256xbf16, #tpu.memory_space<vmem>>, %arg5: memref<1x256xf32, #tpu.memory_space<vmem>>, %arg6: memref<8x256xf32, #tpu.memory_space<vmem>>) attributes {dimension_semantics = [#tpu.dimension_semantics<parallel>], iteration_bounds = array<i64: 2>, scalar_prefetch = 0 : i64, scratch_operands = 0 : i64, tpu.core_type = #tpu.core_type<tc>, window_params = [{transform_indices = @transform_0, window_bounds = array<i64: 8, 256>}, {pipeline_mode = #tpu.pipeline_mode<synchronous>, transform_indices = @transform_1, window_bounds = array<i64: 256, 1024>}, {pipeline_mode = #tpu.pipeline_mode<synchronous>, transform_indices = @transform_2, window_bounds = array<i64: 1, 1024>}, {pipeline_mode = #tpu.pipeline_mode<synchronous>, transform_indices = @transform_3, window_bounds = array<i64: 1024, 256>}, {pipeline_mode = #tpu.pipeline_mode<synchronous>, transform_indices = @transform_4, window_bounds = array<i64: 1, 256>}, {transform_indices = @transform_5, window_bounds = array<i64: 8, 256>}]} {
    %c0 = arith.constant 0 : index
    %c0_0 = arith.constant 0 : index
    %0 = vector.load %arg1[%c0, %c0_0] : memref<8x256xf32, #tpu.memory_space<vmem>>, vector<8x256xf32>
    %1 = arith.truncf %0 : vector<8x256xf32> to vector<8x256xbf16>
    %c0_1 = arith.constant 0 : index
    %c0_2 = arith.constant 0 : index
    %2 = vector.load %arg2[%c0_1, %c0_2] : memref<256x1024xbf16, #tpu.memory_space<vmem>>, vector<256x1024xbf16>
    %cst = arith.constant dense<0.000000e+00> : vector<8x1024xf32>
    %3 = tpu.matmul %1, %2, %cst {dimension_numbers = #tpu.dot_dimension_numbers<[1], [0], [0], [1], [0, 0, 1, 1], [], []>} : vector<8x256xbf16>, vector<256x1024xbf16>, vector<8x1024xf32> -> vector<8x1024xf32>
    %c0_3 = arith.constant 0 : index
    %c0_4 = arith.constant 0 : index
    %4 = vector.load %arg3[%c0_3, %c0_4] : memref<1x1024xf32, #tpu.memory_space<vmem>>, vector<1x1024xf32>
    %5 = vector.broadcast %4 : vector<1x1024xf32> to vector<8x1024xf32>
    %6 = arith.addf %3, %5 : vector<8x1024xf32>
    %cst_5 = arith.constant 0.000000e+00 : f32
    %7 = vector.broadcast %cst_5 : f32 to vector<8x1024xf32>
    %8 = arith.maximumf %6, %7 : vector<8x1024xf32>
    %9 = arith.truncf %8 : vector<8x1024xf32> to vector<8x1024xbf16>
    %c0_6 = arith.constant 0 : index
    %c0_7 = arith.constant 0 : index
    %10 = vector.load %arg4[%c0_6, %c0_7] : memref<1024x256xbf16, #tpu.memory_space<vmem>>, vector<1024x256xbf16>
    %cst_8 = arith.constant dense<0.000000e+00> : vector<8x256xf32>
    %11 = tpu.matmul %9, %10, %cst_8 {dimension_numbers = #tpu.dot_dimension_numbers<[1], [0], [0], [1], [0, 0, 1, 1], [], []>} : vector<8x1024xbf16>, vector<1024x256xbf16>, vector<8x256xf32> -> vector<8x256xf32>
    %c0_9 = arith.constant 0 : index
    %c0_10 = arith.constant 0 : index
    %12 = vector.load %arg5[%c0_9, %c0_10] : memref<1x256xf32, #tpu.memory_space<vmem>>, vector<1x256xf32>
    %13 = vector.broadcast %12 : vector<1x256xf32> to vector<8x256xf32>
    %14 = arith.addf %11, %13 : vector<8x256xf32>
    %15 = arith.addf %0, %14 : vector<8x256xf32>
    %c0_11 = arith.constant 0 : index
    %c0_12 = arith.constant 0 : index
    %16 = vector.load %arg6[%c0_11, %c0_12] : memref<8x256xf32, #tpu.memory_space<vmem>>, vector<8x256xf32>
    tpu.vector_store %arg6[%c0_11, %c0_12], %15 {strides = array<i32>} : memref<8x256xf32, #tpu.memory_space<vmem>>, vector<8x256xf32>,
    return
  }
  func.func @transform_0(%arg0: i32) -> (i32, i32) {
    %c0_i32 = arith.constant 0 : i32
    %c0_i32_0 = arith.constant 0 : i32
    return %arg0, %c0_i32 : i32, i32
  }
  func.func @transform_1(%arg0: i32) -> (i32, i32) {
    %c0_i32 = arith.constant 0 : i32
    %c0_i32_0 = arith.constant 0 : i32
    %c0_i32_1 = arith.constant 0 : i32
    return %c0_i32, %c0_i32_0 : i32, i32
  }
  func.func @transform_2(%arg0: i32) -> (i32, i32) {
    %c0_i32 = arith.constant 0 : i32
    %c0_i32_0 = arith.constant 0 : i32
    %c0_i32_1 = arith.constant 0 : i32
    return %c0_i32, %c0_i32_0 : i32, i32
  }
  func.func @transform_3(%arg0: i32) -> (i32, i32) {
    %c0_i32 = arith.constant 0 : i32
    %c0_i32_0 = arith.constant 0 : i32
    %c0_i32_1 = arith.constant 0 : i32
    return %c0_i32, %c0_i32_0 : i32, i32
  }
  func.func @transform_4(%arg0: i32) -> (i32, i32) {
    %c0_i32 = arith.constant 0 : i32
    %c0_i32_0 = arith.constant 0 : i32
    %c0_i32_1 = arith.constant 0 : i32
    return %c0_i32, %c0_i32_0 : i32, i32
  }
  func.func @transform_5(%arg0: i32) -> (i32, i32) {
    %c0_i32 = arith.constant 0 : i32
    %c0_i32_0 = arith.constant 0 : i32
    return %arg0, %c0_i32 : i32, i32
  }
}

</mosaic_0001>

<bundles_post_ra>
// kernel: tpu_custom_call.1
= control target key start
LH: loop header
LB: loop body
LE: loop exit
PB: predicated region body
PF: predicated region fallthrough
CT: control target
= control target key end

     0   :  { %10 = vsyncpa [#allocation3], 0  ;;  %s3428_s0 = inlined_call_operand.hbm [shape: f32[16,256], index: 0, kind: input, shape index: {}]   ;;  %s3429_s1 = inlined_call_operand.hbm [shape: bf16[256,1024], index: 1, kind: input, shape index: {}]   ;;  %s3430_s2 = inlined_call_operand.hbm [shape: f32[1,1024], index: 2, kind: input, shape index: {}]   ;;  %s3431_s3 = inlined_call_operand.hbm [shape: bf16[1024,256], index: 3, kind: input, shape index: {}]   ;;  %s3432_s4 = inlined_call_operand.vmem [shape: f32[1,256], index: 4, kind: input, shape index: {}]   ;;  %s3433_s5 = inlined_call_operand.hbm [shape: f32[16,256], index: 5, kind: output, shape index: {}]  }
   0x1   :  { %12 = vsyncpa [#allocation3 + $0x1], 0 }
   0x2   :  { %13 = vsyncpa [#allocation6], 0 }
   0x3   :  { %14 = vsyncpa [#allocation9], 0 }
   0x4   :  { %15 = vsyncpa [#allocation4], 0 }
   0x5   :  { %17 = vsyncpa [#allocation4 + $0x1], 0  ;;  %s3121_s18 = smov 0   ;;  %s3123_s19 = smov 0  }
   0x6   :  { %s3125_s20 = smov 0   ;;  %s3127_s21 = smov 0  }
   0x7 LB: > { %s3142_s22 = sadd.s32 4294967295, %s3080_s21   ;;  %s2339_s23 = sadd.s32 4294967294, %s3080_s21   ;;  %s3080_s21 = sphi %s3127_s21, %s3456_s21   ;;  %s3076_s20 = sphi %s3125_s20, %s3455_s20   ;;  %s3072_s19 = sphi %s3123_s19, %s3454_s19   ;;  %s3068_s18 = sphi %s3121_s18, %s3453_s18  }
   0x8   : > { %p43_p0 = scmp.ne.s32.totalorder %s3072_s19, %s3068_s18  ;;  %p3434_p1 = scmp.eq.s32.totalorder %s3142_s22, 0 }
   0x9   : > { %p157_p3 = scmp.eq.s32.totalorder %s2339_s23, 1  ;;  %p2340_p5 = scmp.ge.s32.totalorder %s3080_s21, 1 }
   0xa   : > { %p3151_p4 = por %p3434_p1, %p43_p0  ;;  %p164_p7 = scmp.lt.s32.totalorder %s3080_s21, 3 }
   0xb   : > { %p3156_p6 = por %p157_p3, %p43_p0  ;;  %s3082_s27 = smov [#allocation5]  }
   0xc   : > { %s3437_s24 = scalar_select %p3151_p4, 1, 0 }
   0xd   : > { %s3438_s25 = scalar_select %p3156_p6, 1, 0 }
   0xe   : > { %p3161_p8 = pnand %p2340_p5, %p164_p7  ;;  %s176_s28 = sshll.u32 %s3082_s27, 4  ;;  %s3165_s28 = int_to_ptr.vmem [resolvable:$true] %s176_s28 }
   0xf   : > { %s3083_s30 = smov [#allocation7]   ;;  %s3084_s7 = smov [#allocation8]  }
  0x10   : > { %s3439_s26 = scalar_select %p3161_p8, 1, 0 }
  0x11   : > { %p2633_p9 = pneg %p3161_p8  ;;  %s190_s6 = sshll.u32 %s3083_s30, 4  ;;  %s3176_s6 = int_to_ptr.vmem [resolvable:$true] %s190_s6 }
  0x12   : > { %s3178_s8 = sshll.u32 %s3084_s7, 4  ;;  %s2892_s11 = scalar_lea.hbm %s3429_s1, 16384  ;;  %s201_s8 = int_to_ptr.vmem [resolvable:$true] %s3178_s8 }
  0x13   : > { %p3172_p11 = pnand %p2633_p9, %p3434_p1  ;;  %p2893_p12 = scmp.ne.s32.totalorder %s3429_s1, %s2892_s11 }
  0x14   : > { %p2899_p5 = scmp.lt.u32.totalorder %s2892_s11, %s3429_s1 }
  0x15   : > { %p3188_p13 = pneg %p3172_p11 }
  0x17   : > { %p2895_p0 = pnand %p3188_p13, %p2893_p12 }
  0x19   : > { %p2896_p3 = pneg %p2895_p0 }
  0x1b   : > { %p2901_p7 = pnand %p2899_p5, %p2896_p3 }
  0x1d   : > { %2904 = shalt.err (!%p2901_p7)
}
  0x1e   : > { %s2905_s17 = scalar_lea.vmem %s3165_s28, 16384  ;;  %p2913_p2 = scmp.lt.s32.totalorder %s3165_s28, %s3165_s28 }
  0x1f   : > { %p2906_p9 = scmp.ne.s32.totalorder %s3165_s28, %s2905_s17  ;;  %p2914_p6 = scmp.lt.s32.totalorder %s2905_s17, %s2905_s17 }
  0x21   : > { %p2908_p10 = pnand %p2906_p9, %p3188_p13  ;;  %p2915_p12 = por %p2914_p6, %p2913_p2 }
  0x23   : > { %p2909_p1 = pneg %p2908_p10 }
  0x25   : > { %p2916_p0 = pnand %p2915_p12, %p2909_p1 }
  0x27   : > { %2919 = shalt.err (!%p2916_p0)
}
  0x28   : > { %s3085_s23 = smov 512   ;;  %s3086_s27 = smov 32  }
  0x29   : > { %2636 = dma.hbm_to_vmem [thread:$0]  (!%p3172_p11), %s3429_s1, 16384, %s3165_s28, [#allocation6], %s3085_s23, %s3085_s23, %s3086_s27  }
  0x2a   : > { %s2920_s11 = scalar_lea.hbm %s3430_s2, 128 }
  0x2b   : > { %p2921_p2 = scmp.ne.s32.totalorder %s3430_s2, %s2920_s11  ;;  %p2927_p10 = scmp.lt.u32.totalorder %s2920_s11, %s3430_s2 }
  0x2d   : > { %p2923_p1 = pnand %p2921_p2, %p3188_p13 }
  0x2f   : > { %p2924_p6 = pneg %p2923_p1 }
  0x31   : > { %p2929_p3 = pnand %p2927_p10, %p2924_p6 }
  0x33   : > { %2932 = shalt.err (!%p2929_p3)
}
  0x34   : > { %s2933_s28 = scalar_lea.vmem %s3176_s6, 128  ;;  %p2941_p12 = scmp.lt.s32.totalorder %s3176_s6, %s3176_s6 }
  0x35   : > { %p2934_p5 = scmp.ne.s32.totalorder %s3176_s6, %s2933_s28  ;;  %p2942_p0 = scmp.lt.s32.totalorder %s2933_s28, %s2933_s28 }
  0x37   : > { %p2936_p7 = pnand %p2934_p5, %p3188_p13  ;;  %p2943_p2 = por %p2942_p0, %p2941_p12 }
  0x39   : > { %p2937_p9 = pneg %p2936_p7 }
  0x3b   : > { %p2944_p1 = pnand %p2943_p2, %p2937_p9 }
  0x3d   : > { %2947 = shalt.err (!%p2944_p1)
}
  0x3e   : > { %2639 = dma.hbm_to_vmem [thread:$0]  (!%p3172_p11), %s3430_s2, 128, %s3176_s6, [#allocation6]  }
  0x3f   : > { %s2948_s7 = scalar_lea.hbm %s3431_s3, 16384 }
  0x40   : > { %p2949_p6 = scmp.ne.s32.totalorder %s3431_s3, %s2948_s7  ;;  %p2955_p5 = scmp.lt.u32.totalorder %s2948_s7, %s3431_s3 }
  0x42   : > { %p2951_p10 = pnand %p2949_p6, %p3188_p13 }
  0x44   : > { %p2952_p3 = pneg %p2951_p10 }
  0x46   : > { %p2957_p7 = pnand %p2955_p5, %p2952_p3 }
  0x48   : > { %2960 = shalt.err (!%p2957_p7)
}
  0x49   : > { %s2961_s13 = scalar_lea.vmem %s201_s8, 16384  ;;  %p2969_p2 = scmp.lt.s32.totalorder %s201_s8, %s201_s8 }
  0x4a   : > { %p2962_p9 = scmp.ne.s32.totalorder %s201_s8, %s2961_s13  ;;  %p2970_p1 = scmp.lt.s32.totalorder %s2961_s13, %s2961_s13 }
  0x4c   : > { %p2964_p12 = pnand %p2962_p9, %p3188_p13  ;;  %p2971_p4 = por %p2970_p1, %p2969_p2 }
  0x4e   : > { %p2965_p0 = pneg %p2964_p12 }
  0x50   : > { %p2972_p8 = pnand %p2971_p4, %p2965_p0 }
  0x52   : > { %2975 = shalt.err (!%p2972_p8)
}
  0x53   : > { %s3087_s6 = smov 128   ;;  %s3088_s14 = smov 8  }
  0x54   : > { %2642 = dma.hbm_to_vmem [thread:$0]  (!%p3172_p11), %s3431_s3, 16384, %s201_s8, [#allocation9], %s3087_s6, %s3087_s6, %s3088_s14  }
  0x55   : > { %s3252_s28 = sadd.s32 1, %s3080_s21   ;;  %s30_s23 = sadd.s32 1, %s3076_s20 }
  0x56   : > { %s27_s17 = ssub.s32 %s3080_s21, %s3252_s28  ;;  %p37_p8 = scmp.ne.s32.totalorder %s3076_s20, %s3072_s19 }
  0x57   : > { %p28_p4 = scmp.eq.s32.totalorder %s27_s17, 0  ;;  %p38_p13 = scmp.eq.s32.totalorder %s3080_s21, 0 }
  0x58   : > { %p2654_p6 = scmp.lt.s32.totalorder %s3080_s21, 2  ;;  %p3442_p3 = scmp.eq.s32.totalorder %s3142_s22, 1 }
  0x59   : > { %s3262_s27 = scalar_select %p28_p4, %s3076_s20, %s30_s23  }
  0x5a   : > { %p39_p10 = por %p38_p13, %p37_p8  ;;  %p3266_p5 = por %p3442_p3, %p37_p8 }
  0x5b   : > { %s217_s29 = sand.u32 1, %s3076_s20   ;;  %s2615_s7 = sshll.u32 %s3080_s21, 8 }
  0x5c   : > { %s2345_s8 = sshll.u32 %s217_s29, 4  ;;  %s3275_s11 = scalar_lea.hbm %s3428_s0, %s2615_s7 }
  0x5d   : > { %s221_s12 = scalar_lea.vmem [#allocation2], %s2345_s8  ;;  %p3277_p11 = pnand %p2654_p6, %p39_p10 }
  0x5e   : > { %s229_s13 = sshll.u32 %s221_s12, 4  ;;  %s218_s14 = scalar_lea.sflag [#allocation3], %s217_s29  ;;  %s3281_s13 = int_to_ptr.vmem [resolvable:$true] %s229_s13 }
  0x5f   : > { %s2976_s15 = scalar_lea.hbm %s3275_s11, 256  ;;  %p2978_p9 = pneg %p3277_p11 }
  0x60   : > { %p2977_p7 = scmp.ne.s32.totalorder %s3275_s11, %s2976_s15  ;;  %s2981_s23 = scalar_lea.hbm %s3428_s0, 512 }
  0x61   : > { %p2982_p2 = scmp.lt.u32.totalorder %s3275_s11, %s3428_s0  ;;  %p2983_p1 = scmp.lt.u32.totalorder %s2981_s23, %s2976_s15 }
  0x62   : > { %p2979_p12 = pnand %p2978_p9, %p2977_p7  ;;  %p2985_p8 = scmp.lt.u32.totalorder %s2976_s15, %s3275_s11 }
  0x63   : > { %p2984_p4 = por %p2983_p1, %p2982_p2 }
  0x64   : > { %p2980_p0 = pneg %p2979_p12 }
  0x65   : > { %p2986_p13 = por %p2985_p8, %p2984_p4 }
  0x67   : > { %p2987_p6 = pnand %p2986_p13, %p2980_p0 }
  0x69   : > { %2990 = shalt.err (!%p2987_p6)
}
  0x6a   : > { %s2991_s29 = scalar_lea.vmem %s3281_s13, 256  ;;  %s3089_s9 = smov [#allocation2]  }
  0x6b   : > { %p2992_p10 = scmp.ne.s32.totalorder %s3281_s13, %s2991_s29  ;;  %s2996_s10 = sshll.u32 %s3089_s9, 4  ;;  %s2997_s10 = int_to_ptr.vmem [resolvable:$false] %s2996_s10 }
  0x6c   : > { %s2998_s12 = scalar_lea.vmem %s2997_s10, 512  ;;  %p2999_p12 = scmp.lt.s32.totalorder %s3281_s13, %s2997_s10 }
  0x6d   : > { %p2994_p3 = pnand %p2992_p10, %p2978_p9  ;;  %p3000_p2 = scmp.lt.s32.totalorder %s2998_s12, %s2991_s29 }
  0x6f   : > { %p2995_p7 = pneg %p2994_p3  ;;  %p3001_p1 = por %p3000_p2, %p2999_p12 }
  0x71   : > { %p3002_p4 = pnand %p3001_p1, %p2995_p7 }
  0x73   : > { %3005 = shalt.err (!%p3002_p4)
}
  0x74   : > { %2646 = dma.hbm_to_vmem [thread:$0]  (!%p3277_p11), %s3275_s11, 256, %s3281_s13, %s218_s14  }
  0x75   : > { %p3445_p0 = scmp.ne.s32.totalorder %s3439_s26, 0 }
  0x76   : > { %s3311_s15 = sand.u32 (!%p3445_p0), 1, %s3072_s19   ;;  %p3446_p9 = scmp.ne.s32.totalorder (!%p3445_p0), %s3437_s24, 0 }
  0x77   : > { %238 = sbr.rel (%p3445_p0) target bundleno = 719 (0x2cf), region = 40  ;;  %s2349_s16 = sshll.u32 (!%p3445_p0), %s3311_s15, 4 }
  0x78   : > { %s241_s17 = scalar_lea.sflag (!%p3445_p0), [#allocation3], %s3311_s15  ;;  %s3317_s23 = scalar_lea.vmem (!%p3445_p0), [#allocation2], %s2349_s16 }
  0x7e   : > { %3051 = dma.done.wait (%p3446_p9), %s241_s17, 256  }
  0x7f   : > { %3053 = vsyncadd (%p3446_p9), %s241_s17, 4294967040  ;;  %p3447_p11 = scmp.eq.s32.totalorder %s3142_s22, 0 }
  0x81   : > { %3055 = dma.done.wait (%p3447_p11), [#allocation6], 16512   ;;  %p3448_p8 = pmov %p3447_p11 }
  0x83   : > { %3057 = vsyncadd (%p3448_p8), [#allocation6], 4294950784  ;;  %p3449_p13 = pmov %p3448_p8 }
  0x84   : > { %p3450_p6 = pmov %p3448_p8 }
  0x85   : > { %3059 = dma.done.wait (%p3449_p13), [#allocation9], 16384  }
  0x86   : > { %3061 = vsyncadd (%p3450_p6), [#allocation9], 4294950912  ;;  %v287_v0 = vld [vmem:[#allocation5] sm:$0xff]  ;;  %v288_v2 = vld [vmem:[#allocation5 + $0x8] sm:$0xff]  ;;  %s2616_s11 = sshll.u32 %s3142_s22, 8  ;;  %s282_s13 = scalar_lea.vmem [#allocation10], %s2349_s16 }
  0x87   : > { %v291_v1 = vld [vmem:[#allocation5 + $0x20] sm:$0xff]  ;;  %v292_v4 = vld [vmem:[#allocation5 + $0x28] sm:$0xff]  ;;  %s2240_s6 = sshll.u32 %s282_s13, 4  ;;  %s3384_s8 = scalar_lea.hbm %s3433_s5, %s2616_s11  ;;  %s3386_s6 = int_to_ptr.vmem [resolvable:$true] %s2240_s6 }
  0x88   : > { %v2355_v3 = vcombine.high %v287_v0, %v291_v1  ;;  %v2354_v5 = vcombine.low %v287_v0, %v291_v1  ;;  %v295_v6 = vld [vmem:[#allocation5 + $0x40] sm:$0xff]  ;;  %v2357_v8 = vcombine.high %v288_v2, %v292_v4  ;;  %v2356_v9 = vcombine.low %v288_v2, %v292_v4  ;;  %v296_v11 = vld [vmem:[#allocation5 + $0x48] sm:$0xff]  ;;  %s2226_s22 = scalar_lea.sflag [#allocation4], %s3311_s15  ;;  %s3006_s29 = scalar_lea.vmem %s3386_s6, 256 }
  0x89   : > { %v299_v7 = vld [vmem:[#allocation5 + $0x60] sm:$0xff]  ;;  %v300_v12 = vld [vmem:[#allocation5 + $0x68] sm:$0xff]  ;;  %p3007_p10 = scmp.ne.s32.totalorder %s3386_s6, %s3006_s29  ;;  %s3090_s9 = smov [#allocation10]  }
  0x8a   : > { %v2363_v10 = vcombine.high %v295_v6, %v299_v7  ;;  %v303_v13 = vld [vmem:[#allocation5 + $0x80] sm:$0xff]  ;;  %1097 = vmatprep.subr.bf16.mxu0 %v2355_v3  ;;  %v2365_v14 = vcombine.high %v296_v11, %v300_v12  ;;  %v304_v16 = vld [vmem:[#allocation5 + $0x88] sm:$0xff]  ;;  %1138 = vmatprep.subr.bf16.mxu1 %v2357_v8  ;;  %v2362_v18 = vcombine.low %v295_v6, %v299_v7  ;;  %s3010_s10 = sshll.u32 %s3090_s9, 4  ;;  %s3011_s10 = int_to_ptr.vmem [resolvable:$false] %s3010_s10 }
  0x8b   : > { %v307_v15 = vld [vmem:[#allocation5 + $0xa0] sm:$0xff]  ;;  %v308_v17 = vld [vmem:[#allocation5 + $0xa8] sm:$0xff]  ;;  %1098 = vmatpush1.bf16.msra.mxu0 %v2354_v5  ;;  %1139 = vmatpush1.bf16.msra.mxu1 %v2356_v9  ;;  %v2364_v19 = vcombine.low %v296_v11, %v300_v12  ;;  %p3008_p3 = pnand %p3007_p10, %p3266_p5  ;;  %s3012_s12 = scalar_lea.vmem %s3011_s10, 512 }
  0x8c   : > { %1099 = vmatprep.subr.bf16.mxu0 %v2363_v10  ;;  %v2371_v20 = vcombine.high %v303_v13, %v307_v15  ;;  %1140 = vmatprep.subr.bf16.mxu1 %v2365_v14  ;;  %v2373_v21 = vcombine.high %v304_v16, %v308_v17  ;;  %v311_v22 = vld [vmem:[#allocation5 + $0xc0] sm:$0xff]  ;;  %v312_v24 = vld [vmem:[#allocation5 + $0xc8] sm:$0xff]  ;;  %v2370_v26 = vcombine.low %v303_v13, %v307_v15  ;;  %p3013_p12 = scmp.lt.s32.totalorder %s3386_s6, %s3011_s10  ;;  %p3014_p2 = scmp.lt.s32.totalorder %s3012_s12, %s3006_s29 }
  0x8d   : > { %v315_v23 = vld [vmem:[#allocation5 + $0xe0] sm:$0xff]  ;;  %v316_v25 = vld [vmem:[#allocation5 + $0xe8] sm:$0xff]  ;;  %v2372_v27 = vcombine.low %v304_v16, %v308_v17  ;;  %p3009_p7 = pneg %p3008_p3 }
  0x8e   : > { %v2379_v28 = vcombine.high %v311_v22, %v315_v23  ;;  %v2381_v29 = vcombine.high %v312_v24, %v316_v25  ;;  %v319_v30 = vld [vmem:[#allocation5 + $0x100] sm:$0xff]  ;;  %v320_v32 = vld [vmem:[#allocation5 + $0x108] sm:$0xff]  ;;  %v2378_v34 = vcombine.low %v311_v22, %v315_v23  ;;  %v2380_v35 = vcombine.low %v312_v24, %v316_v25  ;;  %p3015_p1 = por %p3014_p2, %p3013_p12 }
  0x8f   : > { %1100 = vmatpush1.bf16.msra.mxu0 %v2362_v18  ;;  %1141 = vmatpush1.bf16.msra.mxu1 %v2364_v19  ;;  %v323_v31 = vld [vmem:[#allocation5 + $0x120] sm:$0xff]  ;;  %v324_v33 = vld [vmem:[#allocation5 + $0x128] sm:$0xff] }
  0x90   : > { %1101 = vmatprep.subr.bf16.mxu0 %v2371_v20  ;;  %1142 = vmatprep.subr.bf16.mxu1 %v2373_v21  ;;  %v2387_v36 = vcombine.high %v319_v30, %v323_v31  ;;  %v2389_v37 = vcombine.high %v320_v32, %v324_v33  ;;  %v327_v38 = vld [vmem:[#allocation5 + $0x140] sm:$0xff]  ;;  %v328_v40 = vld [vmem:[#allocation5 + $0x148] sm:$0xff]  ;;  %v2386_v42 = vcombine.low %v319_v30, %v323_v31  ;;  %p3016_p4 = pnand %p3015_p1, %p3009_p7 }
  0x91   : > { %v331_v39 = vld [vmem:[#allocation5 + $0x160] sm:$0xff]  ;;  %v332_v41 = vld [vmem:[#allocation5 + $0x168] sm:$0xff]  ;;  %v2388_v43 = vcombine.low %v320_v32, %v324_v33 }
  0x92   : > { %v2395_v44 = vcombine.high %v327_v38, %v331_v39  ;;  %v2397_v45 = vcombine.high %v328_v40, %v332_v41  ;;  %v335_v46 = vld [vmem:[#allocation5 + $0x180] sm:$0xff]  ;;  %v336_v48 = vld [vmem:[#allocation5 + $0x188] sm:$0xff]  ;;  %v2394_v50 = vcombine.low %v327_v38, %v331_v39  ;;  %v2396_v51 = vcombine.low %v328_v40, %v332_v41 }
  0x93   : > { %1102 = vmatpush1.bf16.msra.mxu0 %v2370_v26  ;;  %1143 = vmatpush1.bf16.msra.mxu1 %v2372_v27  ;;  %v339_v47 = vld [vmem:[#allocation5 + $0x1a0] sm:$0xff]  ;;  %v340_v49 = vld [vmem:[#allocation5 + $0x1a8] sm:$0xff] }
  0x94   : > { %1103 = vmatprep.subr.bf16.mxu0 %v2379_v28  ;;  %1144 = vmatprep.subr.bf16.mxu1 %v2381_v29  ;;  %v2403_v52 = vcombine.high %v335_v46, %v339_v47  ;;  %v284_v53 = vld [vmem:[%s3317_s23 + $0x8] sm:$0xff]  ;;  %v2405_v54 = vcombine.high %v336_v48, %v340_v49  ;;  %v343_v55 = vld [vmem:[#allocation5 + $0x1c0] sm:$0xff]  ;;  %v2402_v60 = vcombine.low %v335_v46, %v339_v47 }
  0x95   : > { %v347_v56 = vld [vmem:[#allocation5 + $0x1e0] sm:$0xff]  ;;  %v3332_v57 = vpack.c.bf16 %v284_v53, %v284_v53  ;;  %v344_v58 = vld [vmem:[#allocation5 + $0x1c8] sm:$0xff]  ;;  %v2404_v61 = vcombine.low %v336_v48, %v340_v49 }
  0x96   : > { %v348_v59 = vld [vmem:[#allocation5 + $0x1e8] sm:$0xff]  ;;  %v2411_v62 = vcombine.high %v343_v55, %v347_v56  ;;  %v351_v0 = vld [vmem:[#allocation5 + $0x200] sm:$0xff]  ;;  %v2410_v4 = vcombine.low %v343_v55, %v347_v56 }
  0x97   : > { %1104 = vmatpush1.bf16.msra.mxu0 %v2378_v34  ;;  %1145 = vmatpush1.bf16.msra.mxu1 %v2380_v35  ;;  %v2413_v63 = vcombine.high %v344_v58, %v348_v59  ;;  %v355_v1 = vld [vmem:[#allocation5 + $0x220] sm:$0xff]  ;;  %v352_v2 = vld [vmem:[#allocation5 + $0x208] sm:$0xff]  ;;  %v2412_v5 = vcombine.low %v344_v58, %v348_v59 }
  0x98   : > { %1105 = vmatprep.subr.bf16.mxu0 %v2387_v36  ;;  %1146 = vmatprep.subr.bf16.mxu1 %v2389_v37  ;;  %v356_v3 = vld [vmem:[#allocation5 + $0x228] sm:$0xff]  ;;  %v2419_v6 = vcombine.high %v351_v0, %v355_v1  ;;  %v359_v8 = vld [vmem:[#allocation5 + $0x240] sm:$0xff]  ;;  %v2418_v12 = vcombine.low %v351_v0, %v355_v1  ;;  %v289_v0 = vld [vmem:[#allocation5 + $0x10] sm:$0xff] }
  0x99   : > { %1129 = vmatprep.mubr.bf16.mxu0 %v3332_v57  ;;  %1170 = vmatprep.mubr.bf16.mxu1 %v3332_v57  ;;  %v2421_v7 = vcombine.high %v352_v2, %v356_v3  ;;  %v363_v9 = vld [vmem:[#allocation5 + $0x260] sm:$0xff]  ;;  %v360_v10 = vld [vmem:[#allocation5 + $0x248] sm:$0xff]  ;;  %v2420_v13 = vcombine.low %v352_v2, %v356_v3  ;;  %v293_v1 = vld [vmem:[#allocation5 + $0x30] sm:$0xff] }
  0x9a   : > { %v364_v11 = vld [vmem:[#allocation5 + $0x268] sm:$0xff]  ;;  %v2427_v14 = vcombine.high %v359_v8, %v363_v9  ;;  %v367_v16 = vld [vmem:[#allocation5 + $0x280] sm:$0xff]  ;;  %v2426_v20 = vcombine.low %v359_v8, %v363_v9  ;;  %v290_v3 = vld [vmem:[#allocation5 + $0x18] sm:$0xff]  ;;  %v2359_v8 = vcombine.high %v289_v0, %v293_v1 }
  0x9b   : > { %1106 = vmatpush1.bf16.msra.mxu0 %v2386_v42  ;;  %1147 = vmatpush1.bf16.msra.mxu1 %v2388_v43  ;;  %v2429_v15 = vcombine.high %v360_v10, %v364_v11  ;;  %v371_v17 = vld [vmem:[#allocation5 + $0x2a0] sm:$0xff]  ;;  %v368_v18 = vld [vmem:[#allocation5 + $0x288] sm:$0xff]  ;;  %v2428_v21 = vcombine.low %v360_v10, %v364_v11  ;;  %v297_v9 = vld [vmem:[#allocation5 + $0x50] sm:$0xff] }
  0x9c   : > { %1107 = vmatprep.subr.bf16.mxu0 %v2395_v44  ;;  %1148 = vmatprep.subr.bf16.mxu1 %v2397_v45  ;;  %v372_v19 = vld [vmem:[#allocation5 + $0x2a8] sm:$0xff]  ;;  %v2435_v22 = vcombine.high %v367_v16, %v371_v17  ;;  %v375_v24 = vld [vmem:[#allocation5 + $0x2c0] sm:$0xff]  ;;  %v2434_v28 = vcombine.low %v367_v16, %v371_v17  ;;  %v301_v10 = vld [vmem:[#allocation5 + $0x70] sm:$0xff] }
  0x9d   : > { %v2437_v23 = vcombine.high %v368_v18, %v372_v19  ;;  %v379_v25 = vld [vmem:[#allocation5 + $0x2e0] sm:$0xff]  ;;  %v376_v26 = vld [vmem:[#allocation5 + $0x2c8] sm:$0xff]  ;;  %v2436_v29 = vcombine.low %v368_v18, %v372_v19  ;;  %v2367_v17 = vcombine.high %v297_v9, %v301_v10  ;;  %v305_v18 = vld [vmem:[#allocation5 + $0x90] sm:$0xff] }
  0x9e   : > { %v380_v27 = vld [vmem:[#allocation5 + $0x2e8] sm:$0xff]  ;;  %v2443_v30 = vcombine.high %v375_v24, %v379_v25  ;;  %v383_v32 = vld [vmem:[#allocation5 + $0x300] sm:$0xff]  ;;  %v2442_v36 = vcombine.low %v375_v24, %v379_v25  ;;  %v309_v19 = vld [vmem:[#allocation5 + $0xb0] sm:$0xff] }
  0x9f   : > { %1108 = vmatpush1.bf16.msra.mxu0 %v2394_v50  ;;  %1149 = vmatpush1.bf16.msra.mxu1 %v2396_v51  ;;  %v2445_v31 = vcombine.high %v376_v26, %v380_v27  ;;  %v387_v33 = vld [vmem:[#allocation5 + $0x320] sm:$0xff]  ;;  %v384_v34 = vld [vmem:[#allocation5 + $0x308] sm:$0xff]  ;;  %v2444_v37 = vcombine.low %v376_v26, %v380_v27  ;;  %v2375_v25 = vcombine.high %v305_v18, %v309_v19  ;;  %v313_v26 = vld [vmem:[#allocation5 + $0xd0] sm:$0xff] }
  0xa0   : > { %1109 = vmatprep.subr.bf16.mxu0 %v2403_v52  ;;  %1150 = vmatprep.subr.bf16.mxu1 %v2405_v54  ;;  %v388_v35 = vld [vmem:[#allocation5 + $0x328] sm:$0xff]  ;;  %v2451_v38 = vcombine.high %v383_v32, %v387_v33  ;;  %v391_v39 = vld [vmem:[#allocation5 + $0x340] sm:$0xff]  ;;  %v2450_v44 = vcombine.low %v383_v32, %v387_v33  ;;  %v317_v27 = vld [vmem:[#allocation5 + $0xf0] sm:$0xff] }
  0xa1   : > { %v395_v40 = vld [vmem:[#allocation5 + $0x360] sm:$0xff]  ;;  %v2453_v41 = vcombine.high %v384_v34, %v388_v35  ;;  %v392_v42 = vld [vmem:[#allocation5 + $0x348] sm:$0xff]  ;;  %v2452_v45 = vcombine.low %v384_v34, %v388_v35  ;;  %v2383_v33 = vcombine.high %v313_v26, %v317_v27  ;;  %v321_v34 = vld [vmem:[#allocation5 + $0x110] sm:$0xff] }
  0xa2   : > { %v396_v43 = vld [vmem:[#allocation5 + $0x368] sm:$0xff]  ;;  %v2459_v46 = vcombine.high %v391_v39, %v395_v40  ;;  %v399_v47 = vld [vmem:[#allocation5 + $0x380] sm:$0xff]  ;;  %v2458_v52 = vcombine.low %v391_v39, %v395_v40  ;;  %v325_v35 = vld [vmem:[#allocation5 + $0x130] sm:$0xff]  ;;  %v2382_v39 = vcombine.low %v313_v26, %v317_v27 }
  0xa3   : > { %1110 = vmatpush1.bf16.msra.mxu0 %v2402_v60  ;;  %1151 = vmatpush1.bf16.msra.mxu1 %v2404_v61  ;;  %v403_v48 = vld [vmem:[#allocation5 + $0x3a0] sm:$0xff]  ;;  %v2461_v49 = vcombine.high %v392_v42, %v396_v43  ;;  %v400_v50 = vld [vmem:[#allocation5 + $0x388] sm:$0xff]  ;;  %v2460_v53 = vcombine.low %v392_v42, %v396_v43  ;;  %v329_v42 = vld [vmem:[#allocation5 + $0x150] sm:$0xff] }
  0xa4   : > { %1111 = vmatprep.subr.bf16.mxu0 %v2411_v62  ;;  %1152 = vmatprep.subr.bf16.mxu1 %v2413_v63  ;;  %v404_v51 = vld [vmem:[#allocation5 + $0x3a8] sm:$0xff]  ;;  %v2467_v54 = vcombine.high %v399_v47, %v403_v48  ;;  %v407_v55 = vld [vmem:[#allocation5 + $0x3c0] sm:$0xff]  ;;  %v2466_v61 = vcombine.low %v399_v47, %v403_v48  ;;  %v337_v47 = vld [vmem:[#allocation5 + $0x190] sm:$0xff] }
  0xa5   : > { %v411_v56 = vld [vmem:[#allocation5 + $0x3e0] sm:$0xff]  ;;  %v2469_v58 = vcombine.high %v400_v50, %v404_v51  ;;  %v408_v59 = vld [vmem:[#allocation5 + $0x3c8] sm:$0xff]  ;;  %v2468_v62 = vcombine.low %v400_v50, %v404_v51  ;;  %v341_v48 = vld [vmem:[#allocation5 + $0x1b0] sm:$0xff] }
  0xa6   : > { %v412_v60 = vld [vmem:[#allocation5 + $0x3e8] sm:$0xff]  ;;  %v2475_v63 = vcombine.high %v407_v55, %v411_v56  ;;  %v338_v51 = vld [vmem:[#allocation5 + $0x198] sm:$0xff]  ;;  %v381_v26 = vld [vmem:[#allocation5 + $0x2f0] sm:$0xff] }
  0xa7   : > { %1112 = vmatpush1.bf16.msra.mxu0 %v2410_v4  ;;  %1153 = vmatpush1.bf16.msra.mxu1 %v2412_v5  ;;  %v2477_v2 = vcombine.high %v408_v59, %v412_v60  ;;  %v294_v4 = vld [vmem:[#allocation5 + $0x38] sm:$0xff]  ;;  %v2474_v5 = vcombine.low %v407_v55, %v411_v56  ;;  %v345_v55 = vld [vmem:[#allocation5 + $0x1d0] sm:$0xff] }
  0xa8   : > { %1113 = vmatprep.subr.bf16.mxu0 %v2419_v6  ;;  %1154 = vmatprep.subr.bf16.mxu1 %v2421_v7  ;;  %v283_v6 = vld [vmem:[%s3317_s23] sm:$0xff]  ;;  %v2476_v7 = vcombine.low %v408_v59, %v412_v60  ;;  %v2361_v11 = vcombine.high %v290_v3, %v294_v4  ;;  %v2360_v16 = vcombine.low %v290_v3, %v294_v4  ;;  %v346_v60 = vld [vmem:[#allocation5 + $0x1d8] sm:$0xff] }
  0xa9   : > { %v349_v56 = vld [vmem:[#allocation5 + $0x1f0] sm:$0xff]  ;;  %v2407_v59 = vcombine.high %v337_v47, %v341_v48  ;;  %v354_v4 = vld [vmem:[#allocation5 + $0x218] sm:$0xff] }
  0xaa   : > { %v2415_v3 = vcombine.high %v345_v55, %v349_v56 }
  0xab   : > { %1114 = vmatpush1.bf16.msra.mxu0 %v2418_v12  ;;  %1155 = vmatpush1.bf16.msra.mxu1 %v2420_v13  ;;  %v298_v12 = vld [vmem:[#allocation5 + $0x58] sm:$0xff]  ;;  %v3337_v13 = vpack.c.bf16 %v283_v6, %v283_v6 }
  0xac   : > { %1115 = vmatprep.subr.bf16.mxu0 %v2427_v14  ;;  %1156 = vmatprep.subr.bf16.mxu1 %v2429_v15  ;;  %v302_v14 = vld [vmem:[#allocation5 + $0x78] sm:$0xff]  ;;  %v2358_v15 = vcombine.low %v289_v0, %v293_v1  ;;  %v353_v0 = vld [vmem:[#allocation5 + $0x210] sm:$0xff] }
  0xad   : > { %v2368_v24 = vcombine.low %v298_v12, %v302_v14  ;;  %v357_v1 = vld [vmem:[#allocation5 + $0x230] sm:$0xff] }
  0xaf   : > { %1116 = vmatpush1.bf16.msra.mxu0 %v2426_v20  ;;  %1157 = vmatpush1.bf16.msra.mxu1 %v2428_v21  ;;  %v2369_v20 = vcombine.high %v298_v12, %v302_v14  ;;  %v306_v21 = vld [vmem:[#allocation5 + $0x98] sm:$0xff] }
  0xb0   : > { %1117 = vmatprep.subr.bf16.mxu0 %v2435_v22  ;;  %1158 = vmatprep.subr.bf16.mxu1 %v2437_v23  ;;  %v310_v22 = vld [vmem:[#allocation5 + $0xb8] sm:$0xff]  ;;  %v2366_v23 = vcombine.low %v297_v9, %v301_v10  ;;  %v365_v9 = vld [vmem:[#allocation5 + $0x270] sm:$0xff] }
  0xb1   : > { %v2376_v32 = vcombine.low %v306_v21, %v310_v22  ;;  %v362_v12 = vld [vmem:[#allocation5 + $0x258] sm:$0xff] }
  0xb2   : > { %v366_v14 = vld [vmem:[#allocation5 + $0x278] sm:$0xff] }
  0xb3   : > { %1118 = vmatpush1.bf16.msra.mxu0 %v2434_v28  ;;  %1159 = vmatpush1.bf16.msra.mxu1 %v2436_v29  ;;  %v2377_v28 = vcombine.high %v306_v21, %v310_v22  ;;  %v314_v29 = vld [vmem:[#allocation5 + $0xd8] sm:$0xff]  ;;  %v2432_v27 = vcombine.low %v362_v12, %v366_v14 }
  0xb4   : > { %1119 = vmatprep.subr.bf16.mxu0 %v2443_v30  ;;  %1160 = vmatprep.subr.bf16.mxu1 %v2445_v31  ;;  %v318_v30 = vld [vmem:[#allocation5 + $0xf8] sm:$0xff]  ;;  %v2374_v31 = vcombine.low %v305_v18, %v309_v19  ;;  %v373_v18 = vld [vmem:[#allocation5 + $0x2b0] sm:$0xff] }
  0xb5   : > { %v2384_v40 = vcombine.low %v314_v29, %v318_v30  ;;  %v370_v21 = vld [vmem:[#allocation5 + $0x298] sm:$0xff] }
  0xb6   : > { %v374_v22 = vld [vmem:[#allocation5 + $0x2b8] sm:$0xff] }
  0xb7   : > { %1120 = vmatpush1.bf16.msra.mxu0 %v2442_v36  ;;  %1161 = vmatpush1.bf16.msra.mxu1 %v2444_v37  ;;  %v2385_v36 = vcombine.high %v314_v29, %v318_v30  ;;  %v322_v37 = vld [vmem:[#allocation5 + $0x118] sm:$0xff] }
  0xb8   : > { %1121 = vmatprep.subr.bf16.mxu0 %v2451_v38  ;;  %1162 = vmatprep.subr.bf16.mxu1 %v2453_v41  ;;  %v326_v38 = vld [vmem:[#allocation5 + $0x138] sm:$0xff]  ;;  %v2391_v41 = vcombine.high %v321_v34, %v325_v35 }
  0xb9   : > { %v2393_v43 = vcombine.high %v322_v37, %v326_v38  ;;  %v378_v29 = vld [vmem:[#allocation5 + $0x2d8] sm:$0xff] }
  0xba   : > { %v382_v30 = vld [vmem:[#allocation5 + $0x2f8] sm:$0xff] }
  0xbb   : > { %1122 = vmatpush1.bf16.msra.mxu0 %v2450_v44  ;;  %1163 = vmatpush1.bf16.msra.mxu1 %v2452_v45  ;;  %v330_v44 = vld [vmem:[#allocation5 + $0x158] sm:$0xff] }
  0xbc   : > { %1123 = vmatprep.subr.bf16.mxu0 %v2459_v46  ;;  %1164 = vmatprep.subr.bf16.mxu1 %v2461_v49  ;;  %v334_v45 = vld [vmem:[#allocation5 + $0x178] sm:$0xff]  ;;  %v2390_v46 = vcombine.low %v321_v34, %v325_v35  ;;  %v2392_v49 = vcombine.low %v322_v37, %v326_v38  ;;  %v2449_v35 = vcombine.high %v378_v29, %v382_v30  ;;  %v389_v37 = vld [vmem:[#allocation5 + $0x330] sm:$0xff] }
  0xbd   : > { %v386_v38 = vld [vmem:[#allocation5 + $0x318] sm:$0xff] }
  0xbf   : > { %1124 = vmatpush1.bf16.msra.mxu0 %v2458_v52  ;;  %1165 = vmatpush1.bf16.msra.mxu1 %v2460_v53  ;;  %v342_v52 = vld [vmem:[#allocation5 + $0x1b8] sm:$0xff]  ;;  %v2401_v53 = vcombine.high %v330_v44, %v334_v45 }
  0xc0   : > { %1125 = vmatprep.subr.bf16.mxu0 %v2467_v54  ;;  %1166 = vmatprep.subr.bf16.mxu1 %v2469_v58  ;;  %v2400_v58 = vcombine.low %v330_v44, %v334_v45  ;;  %v397_v44 = vld [vmem:[#allocation5 + $0x370] sm:$0xff]  ;;  %v394_v45 = vld [vmem:[#allocation5 + $0x358] sm:$0xff] }
  0xc3   : > { %1126 = vmatpush1.bf16.msra.mxu0 %v2466_v61  ;;  %1167 = vmatpush1.bf16.msra.mxu1 %v2468_v62  ;;  %v350_v61 = vld [vmem:[#allocation5 + $0x1f8] sm:$0xff]  ;;  %v2409_v62 = vcombine.high %v338_v51, %v342_v52 }
  0xc4   : > { %1127 = vmatprep.subr.bf16.mxu0 %v2475_v63  ;;  %1168 = vmatprep.subr.bf16.mxu1 %v2477_v2  ;;  %v2406_v63 = vcombine.low %v337_v47, %v341_v48  ;;  %v2408_v2 = vcombine.low %v338_v51, %v342_v52  ;;  %v2417_v6 = vcombine.high %v346_v60, %v350_v61  ;;  %v401_v51 = vld [vmem:[#allocation5 + $0x390] sm:$0xff] }
  0xc5   : > { %v2416_v10 = vcombine.low %v346_v60, %v350_v61  ;;  %v405_v52 = vld [vmem:[#allocation5 + $0x3b0] sm:$0xff] }
  0xc6   : > { %v409_v60 = vld [vmem:[#allocation5 + $0x3d0] sm:$0xff] }
  0xc7   : > { %1128 = vmatpush1.bf16.msra.mxu0 %v2474_v5  ;;  %1169 = vmatpush1.bf16.msra.mxu1 %v2476_v7  ;;  %v358_v5 = vld [vmem:[#allocation5 + $0x238] sm:$0xff]  ;;  %v2414_v7 = vcombine.low %v345_v55, %v349_v56  ;;  %v413_v61 = vld [vmem:[#allocation5 + $0x3f0] sm:$0xff] }
  0xc8   : > { %1179 = vmatprep.subr.bf16.mxu0 %v2359_v8  ;;  %1220 = vmatprep.subr.bf16.mxu1 %v2361_v11  ;;  %v361_v8 = vld [vmem:[#allocation5 + $0x250] sm:$0xff]  ;;  %v2423_v11 = vcombine.high %v353_v0, %v357_v1  ;;  %v2424_v19 = vcombine.low %v354_v4, %v358_v5 }
  0xca   : > { %1130 = vmatmul.mubr.bf16.vlgmr.msra.gmra.mrb[0].mxu0 %v3337_v13  ;;  %1171 = vmatmul.mubr.bf16.vlgmr.msra.gmra.mrb[0].mxu1 %v3337_v13 }
  0xcb   : > { %1180 = vmatpush1.bf16.msra.mxu0 %v2358_v15  ;;  %1221 = vmatpush1.bf16.msra.mxu1 %v2360_v16  ;;  %v2425_v15 = vcombine.high %v354_v4, %v358_v5  ;;  %v2422_v16 = vcombine.low %v353_v0, %v357_v1  ;;  %v2470_v0 = vcombine.low %v401_v51, %v405_v52 }
  0xcc   : > { %1181 = vmatprep.subr.bf16.mxu0 %v2367_v17  ;;  %1222 = vmatprep.subr.bf16.mxu1 %v2369_v20  ;;  %v369_v17 = vld [vmem:[#allocation5 + $0x290] sm:$0xff]  ;;  %v2431_v20 = vcombine.high %v361_v8, %v365_v9  ;;  %v2478_v4 = vcombine.low %v409_v60, %v413_v61 }
  0xcd   : > { %1211 = vmatprep.mubr.bf16.mxu0 %v3332_v57  ;;  %1252 = vmatprep.mubr.bf16.mxu1 %v3332_v57  ;;  %v333_v57 = vld [vmem:[#allocation5 + $0x170] sm:$0xff] }
  0xce   : > { %v2399_v50 = vcombine.high %v329_v42, %v333_v57  ;;  %v2398_v54 = vcombine.low %v329_v42, %v333_v57 }
  0xcf   : > { %1182 = vmatpush1.bf16.msra.mxu0 %v2366_v23  ;;  %1223 = vmatpush1.bf16.msra.mxu1 %v2368_v24  ;;  %v2433_v23 = vcombine.high %v362_v12, %v366_v14  ;;  %v2430_v24 = vcombine.low %v361_v8, %v365_v9  ;;  %v2698_v8 = vld [vmem:[#allocation8] ss:$8 sps:$4 sm:$0xff]   ;;  %v2704_v12 = vld [vmem:[#allocation8 + $0x10] ss:$8 sps:$4 sm:$0xff]  }
  0xd0   : > { %1183 = vmatprep.subr.bf16.mxu0 %v2375_v25  ;;  %1224 = vmatprep.subr.bf16.mxu1 %v2377_v28  ;;  %v377_v25 = vld [vmem:[#allocation5 + $0x2d0] sm:$0xff]  ;;  %v2439_v28 = vcombine.high %v369_v17, %v373_v18  ;;  %v2707_v14 = vld [vmem:[#allocation8 + $0x110] ss:$8 sps:$4 sm:$0xff]  }
  0xd1   : > { %v2447_v34 = vcombine.high %v377_v25, %v381_v26  ;;  %v2701_v9 = vld [vmem:[#allocation8 + $0x100] ss:$8 sps:$4 sm:$0xff]  }
  0xd3   : > { %1184 = vmatpush1.bf16.msra.mxu0 %v2374_v31  ;;  %1225 = vmatpush1.bf16.msra.mxu1 %v2376_v32  ;;  %v2441_v31 = vcombine.high %v370_v21, %v374_v22  ;;  %v2438_v32 = vcombine.low %v369_v17, %v373_v18  ;;  %v2710_v17 = vld [vmem:[#allocation8 + $0x20] ss:$8 sps:$4 sm:$0xff]  }
  0xd4   : > { %1185 = vmatprep.subr.bf16.mxu0 %v2383_v33  ;;  %1226 = vmatprep.subr.bf16.mxu1 %v2385_v36  ;;  %v2440_v33 = vcombine.low %v370_v21, %v374_v22  ;;  %v385_v36 = vld [vmem:[#allocation5 + $0x310] sm:$0xff]  ;;  %v2716_v21 = vld [vmem:[#allocation8 + $0x30] ss:$8 sps:$4 sm:$0xff]  }
  0xd5   : > { %v2455_v42 = vcombine.high %v385_v36, %v389_v37  ;;  %v2454_v47 = vcombine.low %v385_v36, %v389_v37  ;;  %v2713_v18 = vld [vmem:[#allocation8 + $0x120] ss:$8 sps:$4 sm:$0xff]   ;;  %v2724_v22 = vld [vmem:[#allocation8 + $0x44] ss:$8 sps:$4 sm:$0xff]   ;;  %v2740_v36 = vld [vmem:[#allocation8 + $0x70] ss:$8 sps:$4 sm:$0xff]  }
  0xd6   : > { %v2743_v37 = vld [vmem:[#allocation8 + $0x170] ss:$8 sps:$4 sm:$0xff]  }
  0xd7   : > { %1186 = vmatpush1.bf16.msra.mxu0 %v2382_v39  ;;  %1227 = vmatpush1.bf16.msra.mxu1 %v2384_v40  ;;  %v390_v39 = vld [vmem:[#allocation5 + $0x338] sm:$0xff]  ;;  %v2446_v40 = vcombine.low %v377_v25, %v381_v26  ;;  %v2725_v25 = vld [vmem:[#allocation8 + $0x140] ss:$8 sps:$4 sm:$0xff]  }
  0xd8   : > { %1187 = vmatprep.subr.bf16.mxu0 %v2391_v41  ;;  %1228 = vmatprep.subr.bf16.mxu1 %v2393_v43  ;;  %v2448_v41 = vcombine.low %v378_v29, %v382_v30  ;;  %v2457_v57 = vcombine.high %v386_v38, %v390_v39  ;;  %v393_v43 = vld [vmem:[#allocation5 + $0x350] sm:$0xff]  ;;  %v2456_v48 = vcombine.low %v386_v38, %v390_v39  ;;  %v2730_v26 = vld [vmem:[#allocation8 + $0x54] ss:$8 sps:$4 sm:$0xff]   ;;  %v2731_v29 = vld [vmem:[#allocation8 + $0x150] ss:$8 sps:$4 sm:$0xff]  }
  0xd9   : > { %v2462_v55 = vcombine.low %v393_v43, %v397_v44  ;;  %v2736_v30 = vld [vmem:[#allocation8 + $0x64] ss:$8 sps:$4 sm:$0xff]  }
  0xda   : > { %v2748_v38 = vld [vmem:[#allocation8 + $0x84] ss:$8 sps:$4 sm:$0xff]  }
  0xdb   : > { %1188 = vmatpush1.bf16.msra.mxu0 %v2390_v46  ;;  %1229 = vmatpush1.bf16.msra.mxu1 %v2392_v49  ;;  %v398_v46 = vld [vmem:[#allocation5 + $0x378] sm:$0xff]  ;;  %v2463_v49 = vcombine.high %v393_v43, %v397_v44  ;;  %v2751_v39 = vld [vmem:[#allocation8 + $0x184] ss:$8 sps:$4 sm:$0xff]  }
  0xdc   : > { %1189 = vmatprep.subr.bf16.mxu0 %v2399_v50  ;;  %1230 = vmatprep.subr.bf16.mxu1 %v2401_v53  ;;  %v2465_v50 = vcombine.high %v394_v45, %v398_v46  ;;  %v402_v53 = vld [vmem:[#allocation5 + $0x398] sm:$0xff]  ;;  %v2464_v56 = vcombine.low %v394_v45, %v398_v46  ;;  %v2760_v45 = vld [vmem:[#allocation8 + $0xa4] ss:$8 sps:$4 sm:$0xff]  }
  0xdd   : > { %v2752_v43 = vld [vmem:[#allocation8 + $0x90] ss:$8 sps:$4 sm:$0xff]   ;;  %v2763_v46 = vld [vmem:[#allocation8 + $0x1a4] ss:$8 sps:$4 sm:$0xff]  }
  0xde   : > { %v2755_v44 = vld [vmem:[#allocation8 + $0x190] ss:$8 sps:$4 sm:$0xff]  }
  0xdf   : > { %1190 = vmatpush1.bf16.msra.mxu0 %v2398_v54  ;;  %1231 = vmatpush1.bf16.msra.mxu1 %v2400_v58  ;;  %v406_v54 = vld [vmem:[#allocation5 + $0x3b8] sm:$0xff]  ;;  %v2471_v58 = vcombine.high %v401_v51, %v405_v52 }
  0xe0   : > { %1191 = vmatprep.subr.bf16.mxu0 %v2407_v59  ;;  %1232 = vmatprep.subr.bf16.mxu1 %v2409_v62  ;;  %v2473_v59 = vcombine.high %v402_v53, %v406_v54  ;;  %v410_v62 = vld [vmem:[#allocation5 + $0x3d8] sm:$0xff]  ;;  %v2472_v1 = vcombine.low %v402_v53, %v406_v54  ;;  %v2772_v53 = vld [vmem:[#allocation8 + $0xc4] ss:$8 sps:$4 sm:$0xff]  }
  0xe1   : > { %v2764_v51 = vld [vmem:[#allocation8 + $0xb0] ss:$8 sps:$4 sm:$0xff]   ;;  %v2775_v54 = vld [vmem:[#allocation8 + $0x1c4] ss:$8 sps:$4 sm:$0xff]  }
  0xe2   : > { %v2767_v52 = vld [vmem:[#allocation8 + $0x1b0] ss:$8 sps:$4 sm:$0xff]  }
  0xe3   : > { %1192 = vmatpush1.bf16.msra.mxu0 %v2406_v63  ;;  %1233 = vmatpush1.bf16.msra.mxu1 %v2408_v2  ;;  %v414_v63 = vld [vmem:[#allocation5 + $0x3f8] sm:$0xff]  ;;  %v2479_v2 = vcombine.high %v409_v60, %v413_v61 }
  0xe4   : > { %1193 = vmatprep.subr.bf16.mxu0 %v2415_v3  ;;  %1234 = vmatprep.subr.bf16.mxu1 %v2417_v6  ;;  %v2481_v3 = vcombine.high %v410_v62, %v414_v63  ;;  %v2480_v5 = vcombine.low %v410_v62, %v414_v63  ;;  %v2700_v6 = vld [vmem:[#allocation8 + $0x4] ss:$8 sps:$4 sm:$0xff]   ;;  %v2776_v60 = vld [vmem:[#allocation8 + $0xd0] ss:$8 sps:$4 sm:$0xff]  }
  0xe5   : > { %v2779_v61 = vld [vmem:[#allocation8 + $0x1d0] ss:$8 sps:$4 sm:$0xff]   ;;  %v2784_v62 = vld [vmem:[#allocation8 + $0xe4] ss:$8 sps:$4 sm:$0xff]  }
  0xe6   : > { %v2787_v63 = vld [vmem:[#allocation8 + $0x1e4] ss:$8 sps:$4 sm:$0xff]  }
  0xe7   : > { %1194 = vmatpush1.bf16.msra.mxu0 %v2414_v7  ;;  %1235 = vmatpush1.bf16.msra.mxu1 %v2416_v10  ;;  %v2703_v7 = vld [vmem:[#allocation8 + $0x104] ss:$8 sps:$4 sm:$0xff]   ;;  %v2706_v10 = vld [vmem:[#allocation8 + $0x14] ss:$8 sps:$4 sm:$0xff]  }
  0xe8   : > { %1195 = vmatprep.subr.bf16.mxu0 %v2423_v11  ;;  %1236 = vmatprep.subr.bf16.mxu1 %v2425_v15  ;;  %v2709_v11 = vld [vmem:[#allocation8 + $0x114] ss:$8 sps:$4 sm:$0xff]   ;;  %v2712_v15 = vld [vmem:[#allocation8 + $0x24] ss:$8 sps:$4 sm:$0xff]  }
  0xeb   : > { %1196 = vmatpush1.bf16.msra.mxu0 %v2422_v16  ;;  %1237 = vmatpush1.bf16.msra.mxu1 %v2424_v19  ;;  %v2715_v16 = vld [vmem:[#allocation8 + $0x124] ss:$8 sps:$4 sm:$0xff]   ;;  %v2718_v19 = vld [vmem:[#allocation8 + $0x34] ss:$8 sps:$4 sm:$0xff]  }
  0xec   : > { %1197 = vmatprep.subr.bf16.mxu0 %v2431_v20  ;;  %1238 = vmatprep.subr.bf16.mxu1 %v2433_v23  ;;  %v2721_v20 = vld [vmem:[#allocation8 + $0x134] ss:$8 sps:$4 sm:$0xff]   ;;  %v2727_v23 = vld [vmem:[#allocation8 + $0x144] ss:$8 sps:$4 sm:$0xff]  }
  0xef   : > { %1198 = vmatpush1.bf16.msra.mxu0 %v2430_v24  ;;  %1239 = vmatpush1.bf16.msra.mxu1 %v2432_v27  ;;  %v2722_v24 = vld [vmem:[#allocation8 + $0x40] ss:$8 sps:$4 sm:$0xff]   ;;  %v2733_v27 = vld [vmem:[#allocation8 + $0x154] ss:$8 sps:$4 sm:$0xff]  }
  0xf0   : > { %1199 = vmatprep.subr.bf16.mxu0 %v2439_v28  ;;  %1240 = vmatprep.subr.bf16.mxu1 %v2441_v31  ;;  %v2728_v28 = vld [vmem:[#allocation8 + $0x50] ss:$8 sps:$4 sm:$0xff]   ;;  %v2739_v31 = vld [vmem:[#allocation8 + $0x164] ss:$8 sps:$4 sm:$0xff]  }
  0xf3   : > { %1200 = vmatpush1.bf16.msra.mxu0 %v2438_v32  ;;  %1241 = vmatpush1.bf16.msra.mxu1 %v2440_v33  ;;  %v2734_v32 = vld [vmem:[#allocation8 + $0x60] ss:$8 sps:$4 sm:$0xff]  }
  0xf4   : > { %1201 = vmatprep.subr.bf16.mxu0 %v2447_v34  ;;  %1242 = vmatprep.subr.bf16.mxu1 %v2449_v35  ;;  %v2737_v33 = vld [vmem:[#allocation8 + $0x160] ss:$8 sps:$4 sm:$0xff]   ;;  %v2742_v34 = vld [vmem:[#allocation8 + $0x74] ss:$8 sps:$4 sm:$0xff]  }
  0xf5   : > { %v2745_v35 = vld [vmem:[#allocation8 + $0x174] ss:$8 sps:$4 sm:$0xff]  }
  0xf7   : > { %1202 = vmatpush1.bf16.msra.mxu0 %v2446_v40  ;;  %1243 = vmatpush1.bf16.msra.mxu1 %v2448_v41  ;;  %v2746_v40 = vld [vmem:[#allocation8 + $0x80] ss:$8 sps:$4 sm:$0xff]  }
  0xf8   : > { %1203 = vmatprep.subr.bf16.mxu0 %v2455_v42  ;;  %1244 = vmatprep.subr.bf16.mxu1 %v2457_v57  ;;  %v2749_v41 = vld [vmem:[#allocation8 + $0x180] ss:$8 sps:$4 sm:$0xff]   ;;  %v2754_v42 = vld [vmem:[#allocation8 + $0x94] ss:$8 sps:$4 sm:$0xff]  }
  0xf9   : > { %v2757_v57 = vld [vmem:[#allocation8 + $0x194] ss:$8 sps:$4 sm:$0xff]  }
  0xfb   : > { %1204 = vmatpush1.bf16.msra.mxu0 %v2454_v47  ;;  %1245 = vmatpush1.bf16.msra.mxu1 %v2456_v48  ;;  %v2758_v47 = vld [vmem:[#allocation8 + $0xa0] ss:$8 sps:$4 sm:$0xff]  }
  0xfc   : > { %1205 = vmatprep.subr.bf16.mxu0 %v2463_v49  ;;  %1246 = vmatprep.subr.bf16.mxu1 %v2465_v50  ;;  %v2761_v48 = vld [vmem:[#allocation8 + $0x1a0] ss:$8 sps:$4 sm:$0xff]   ;;  %v2766_v49 = vld [vmem:[#allocation8 + $0xb4] ss:$8 sps:$4 sm:$0xff]  }
  0xfd   : > { %v2769_v50 = vld [vmem:[#allocation8 + $0x1b4] ss:$8 sps:$4 sm:$0xff]  }
  0xff   : > { %1206 = vmatpush1.bf16.msra.mxu0 %v2462_v55  ;;  %1247 = vmatpush1.bf16.msra.mxu1 %v2464_v56  ;;  %v2770_v55 = vld [vmem:[#allocation8 + $0xc0] ss:$8 sps:$4 sm:$0xff]  }
 0x100   : > { %1207 = vmatprep.subr.bf16.mxu0 %v2471_v58  ;;  %1248 = vmatprep.subr.bf16.mxu1 %v2473_v59  ;;  %v2773_v56 = vld [vmem:[#allocation8 + $0x1c0] ss:$8 sps:$4 sm:$0xff]   ;;  %v2778_v58 = vld [vmem:[#allocation8 + $0xd4] ss:$8 sps:$4 sm:$0xff]  }
 0x101   : > { %v2781_v59 = vld [vmem:[#allocation8 + $0x1d4] ss:$8 sps:$4 sm:$0xff]  }
 0x103   : > { %1208 = vmatpush1.bf16.msra.mxu0 %v2470_v0  ;;  %1249 = vmatpush1.bf16.msra.mxu1 %v2472_v1  ;;  %v2782_v0 = vld [vmem:[#allocation8 + $0xe0] ss:$8 sps:$4 sm:$0xff]  }
 0x104   : > { %1209 = vmatprep.subr.bf16.mxu0 %v2479_v2  ;;  %1250 = vmatprep.subr.bf16.mxu1 %v2481_v3  ;;  %v2785_v1 = vld [vmem:[#allocation8 + $0x1e0] ss:$8 sps:$4 sm:$0xff]   ;;  %v2790_v2 = vld [vmem:[#allocation8 + $0xf4] ss:$8 sps:$4 sm:$0xff]  }
 0x105   : > { %v2793_v3 = vld [vmem:[#allocation8 + $0x1f4] ss:$8 sps:$4 sm:$0xff]  }
 0x107   : > { %1210 = vmatpush1.bf16.msra.mxu0 %v2478_v4  ;;  %1251 = vmatpush1.bf16.msra.mxu1 %v2480_v5  ;;  %v2788_v4 = vld [vmem:[#allocation8 + $0xf0] ss:$8 sps:$4 sm:$0xff]  }
 0x108   : > { %2057 = vmatprep.subr.bf16.mxu0 %v2700_v6  ;;  %2098 = vmatprep.subr.bf16.mxu1 %v2703_v7  ;;  %v2791_v5 = vld [vmem:[#allocation8 + $0x1f0] ss:$8 sps:$4 sm:$0xff]   ;;  %v2796_v6 = vld [vmem:[#allocation8 + $0x204] ss:$8 sps:$4 sm:$0xff]  }
 0x109   : > { %v2799_v7 = vld [vmem:[#allocation8 + $0x304] ss:$8 sps:$4 sm:$0xff]  }
 0x10a   : > { %1212 = vmatmul.mubr.bf16.vlgmr.msra.gmra.mrb[4].mxu0 %v3337_v13  ;;  %1253 = vmatmul.mubr.bf16.vlgmr.msra.gmra.mrb[4].mxu1 %v3337_v13  ;;  %v2719_v13 = vld [vmem:[#allocation8 + $0x130] ss:$8 sps:$4 sm:$0xff]  }
 0x10b   : > { %2058 = vmatpush1.bf16.msra.mxu0 %v2698_v8  ;;  %2099 = vmatpush1.bf16.msra.mxu1 %v2701_v9  ;;  %v417_v8 = vlaneseq }
 0x10c   : > { %2059 = vmatprep.subr.bf16.mxu0 %v2706_v10  ;;  %2100 = vmatprep.subr.bf16.mxu1 %v2709_v11  ;;  %v3348_v11 = vld [vmem:[#allocation7] sm:$0xff] }
 0x10d   : > { %v3345_v9 = vshrl.u32 %v417_v8, 7  ;;  %v2845_v8 = vld [vmem:[#allocation8 + $0x380] ss:$8 sps:$4 sm:$0xff]  }
 0x10f   : > { %2060 = vmatpush1.bf16.msra.mxu0 %v2704_v12  ;;  %2101 = vmatpush1.bf16.msra.mxu1 %v2707_v14  ;;  %v419_v10 = vsub.s32 0, %v3345_v9  ;;  %v427_v12 = vsub.s32 2, %v3345_v9  ;;  %v423_v14 = vsub.s32 1, %v3345_v9 }
 0x110   : > { %2061 = vmatprep.subr.bf16.mxu0 %v2712_v15  ;;  %2102 = vmatprep.subr.bf16.mxu1 %v2715_v16  ;;  %v431_v15 = vsub.s32 3, %v3345_v9 }
 0x111   : > { %v420_v16 = vrot.slane %v3348_v11, %v419_v10 }
 0x113   : > { %2062 = vmatpush1.bf16.msra.mxu0 %v2710_v17  ;;  %2103 = vmatpush1.bf16.msra.mxu1 %v2713_v18  ;;  %v428_v17 = vrot.slane %v3348_v11, %v427_v12  ;;  %v424_v18 = vrot.slane %v3348_v11, %v423_v14  ;;  %v2850_v12 = vld [vmem:[#allocation8 + $0x294] ss:$8 sps:$4 sm:$0xff]  }
 0x114   : > { %2063 = vmatprep.subr.bf16.mxu0 %v2718_v19  ;;  %2104 = vmatprep.subr.bf16.mxu1 %v2721_v20  ;;  %v432_v19 = vrot.slane %v3348_v11, %v431_v15  ;;  %v2853_v15 = vld [vmem:[#allocation8 + $0x394] ss:$8 sps:$4 sm:$0xff]  }
 0x117   : > { %2064 = vmatpush1.bf16.msra.mxu0 %v2716_v21  ;;  %2105 = vmatpush1.bf16.msra.mxu1 %v2719_v13 }
 0x118   : > { %2065 = vmatprep.subr.bf16.mxu0 %v2724_v22  ;;  %2106 = vmatprep.subr.bf16.mxu1 %v2727_v23 }
 0x11b   : > { %2066 = vmatpush1.bf16.msra.mxu0 %v2722_v24  ;;  %2107 = vmatpush1.bf16.msra.mxu1 %v2725_v25 }
 0x11c   : > { %2067 = vmatprep.subr.bf16.mxu0 %v2730_v26  ;;  %2108 = vmatprep.subr.bf16.mxu1 %v2733_v27 }
 0x11f   : > { %2068 = vmatpush1.bf16.msra.mxu0 %v2728_v28  ;;  %2109 = vmatpush1.bf16.msra.mxu1 %v2731_v29 }
 0x120   : > { %2069 = vmatprep.subr.bf16.mxu0 %v2736_v30  ;;  %2110 = vmatprep.subr.bf16.mxu1 %v2739_v31 }
 0x123   : > { %2070 = vmatpush1.bf16.msra.mxu0 %v2734_v32  ;;  %2111 = vmatpush1.bf16.msra.mxu1 %v2737_v33 }
 0x124   : > { %2071 = vmatprep.subr.bf16.mxu0 %v2742_v34  ;;  %2112 = vmatprep.subr.bf16.mxu1 %v2745_v35 }
 0x127   : > { %2072 = vmatpush1.bf16.msra.mxu0 %v2740_v36  ;;  %2113 = vmatpush1.bf16.msra.mxu1 %v2743_v37 }
 0x128   : > { %2073 = vmatprep.subr.bf16.mxu0 %v2748_v38  ;;  %2114 = vmatprep.subr.bf16.mxu1 %v2751_v39  ;;  %v2794_v38 = vld [vmem:[#allocation8 + $0x200] ss:$8 sps:$4 sm:$0xff]  }
 0x12b   : > { %2074 = vmatpush1.bf16.msra.mxu0 %v2746_v40  ;;  %2115 = vmatpush1.bf16.msra.mxu1 %v2749_v41  ;;  %v2797_v40 = vld [vmem:[#allocation8 + $0x300] ss:$8 sps:$4 sm:$0xff]   ;;  %v2802_v41 = vld [vmem:[#allocation8 + $0x214] ss:$8 sps:$4 sm:$0xff]  }
 0x12c   : > { %2075 = vmatprep.subr.bf16.mxu0 %v2754_v42  ;;  %2116 = vmatprep.subr.bf16.mxu1 %v2757_v57  ;;  %v2805_v42 = vld [vmem:[#allocation8 + $0x314] ss:$8 sps:$4 sm:$0xff]   ;;  %v2800_v57 = vld [vmem:[#allocation8 + $0x210] ss:$8 sps:$4 sm:$0xff]  }
 0x12f   : > { %2076 = vmatpush1.bf16.msra.mxu0 %v2752_v43  ;;  %2117 = vmatpush1.bf16.msra.mxu1 %v2755_v44  ;;  %v2803_v43 = vld [vmem:[#allocation8 + $0x310] ss:$8 sps:$4 sm:$0xff]   ;;  %v2808_v44 = vld [vmem:[#allocation8 + $0x224] ss:$8 sps:$4 sm:$0xff]  }
 0x130   : > { %2077 = vmatprep.subr.bf16.mxu0 %v2760_v45  ;;  %2118 = vmatprep.subr.bf16.mxu1 %v2763_v46  ;;  %v2811_v45 = vld [vmem:[#allocation8 + $0x324] ss:$8 sps:$4 sm:$0xff]   ;;  %v2806_v46 = vld [vmem:[#allocation8 + $0x220] ss:$8 sps:$4 sm:$0xff]  }
 0x133   : > { %2078 = vmatpush1.bf16.msra.mxu0 %v2758_v47  ;;  %2119 = vmatpush1.bf16.msra.mxu1 %v2761_v48  ;;  %v2809_v47 = vld [vmem:[#allocation8 + $0x320] ss:$8 sps:$4 sm:$0xff]   ;;  %v2814_v48 = vld [vmem:[#allocation8 + $0x234] ss:$8 sps:$4 sm:$0xff]  }
 0x134   : > { %2079 = vmatprep.subr.bf16.mxu0 %v2766_v49  ;;  %2120 = vmatprep.subr.bf16.mxu1 %v2769_v50  ;;  %v2817_v49 = vld [vmem:[#allocation8 + $0x334] ss:$8 sps:$4 sm:$0xff]   ;;  %v2812_v50 = vld [vmem:[#allocation8 + $0x230] ss:$8 sps:$4 sm:$0xff]  }
 0x137   : > { %2080 = vmatpush1.bf16.msra.mxu0 %v2764_v51  ;;  %2121 = vmatpush1.bf16.msra.mxu1 %v2767_v52  ;;  %v2815_v51 = vld [vmem:[#allocation8 + $0x330] ss:$8 sps:$4 sm:$0xff]   ;;  %v2820_v52 = vld [vmem:[#allocation8 + $0x244] ss:$8 sps:$4 sm:$0xff]  }
 0x138   : > { %2081 = vmatprep.subr.bf16.mxu0 %v2772_v53  ;;  %2122 = vmatprep.subr.bf16.mxu1 %v2775_v54  ;;  %v2823_v53 = vld [vmem:[#allocation8 + $0x344] ss:$8 sps:$4 sm:$0xff]   ;;  %v2818_v54 = vld [vmem:[#allocation8 + $0x240] ss:$8 sps:$4 sm:$0xff]  }
 0x13b   : > { %2082 = vmatpush1.bf16.msra.mxu0 %v2770_v55  ;;  %2123 = vmatpush1.bf16.msra.mxu1 %v2773_v56  ;;  %v2821_v55 = vld [vmem:[#allocation8 + $0x340] ss:$8 sps:$4 sm:$0xff]   ;;  %v2826_v56 = vld [vmem:[#allocation8 + $0x254] ss:$8 sps:$4 sm:$0xff]  }
 0x13c   : > { %2083 = vmatprep.subr.bf16.mxu0 %v2778_v58  ;;  %2124 = vmatprep.subr.bf16.mxu1 %v2781_v59  ;;  %v2829_v58 = vld [vmem:[#allocation8 + $0x354] ss:$8 sps:$4 sm:$0xff]   ;;  %v2824_v59 = vld [vmem:[#allocation8 + $0x250] ss:$8 sps:$4 sm:$0xff]  }
 0x13f   : > { %2084 = vmatpush1.bf16.msra.mxu0 %v2776_v60  ;;  %2125 = vmatpush1.bf16.msra.mxu1 %v2779_v61  ;;  %v2827_v60 = vld [vmem:[#allocation8 + $0x350] ss:$8 sps:$4 sm:$0xff]   ;;  %v2832_v61 = vld [vmem:[#allocation8 + $0x264] ss:$8 sps:$4 sm:$0xff]  }
 0x140   : > { %2085 = vmatprep.subr.bf16.mxu0 %v2784_v62  ;;  %2126 = vmatprep.subr.bf16.mxu1 %v2787_v63  ;;  %v2835_v62 = vld [vmem:[#allocation8 + $0x364] ss:$8 sps:$4 sm:$0xff]   ;;  %v2830_v63 = vld [vmem:[#allocation8 + $0x260] ss:$8 sps:$4 sm:$0xff]  }
 0x143   : > { %2086 = vmatpush1.bf16.msra.mxu0 %v2782_v0  ;;  %2127 = vmatpush1.bf16.msra.mxu1 %v2785_v1  ;;  %v2833_v0 = vld [vmem:[#allocation8 + $0x360] ss:$8 sps:$4 sm:$0xff]   ;;  %v2838_v1 = vld [vmem:[#allocation8 + $0x274] ss:$8 sps:$4 sm:$0xff]  }
 0x144   : > { %2087 = vmatprep.subr.bf16.mxu0 %v2790_v2  ;;  %2128 = vmatprep.subr.bf16.mxu1 %v2793_v3  ;;  %v2841_v2 = vld [vmem:[#allocation8 + $0x374] ss:$8 sps:$4 sm:$0xff]   ;;  %v2836_v3 = vld [vmem:[#allocation8 + $0x270] ss:$8 sps:$4 sm:$0xff]  }
 0x147   : > { %2088 = vmatpush1.bf16.msra.mxu0 %v2788_v4  ;;  %2129 = vmatpush1.bf16.msra.mxu1 %v2791_v5  ;;  %v2839_v4 = vld [vmem:[#allocation8 + $0x370] ss:$8 sps:$4 sm:$0xff]   ;;  %v2844_v5 = vld [vmem:[#allocation8 + $0x284] ss:$8 sps:$4 sm:$0xff]  }
 0x148   : > { %2139 = vmatprep.subr.bf16.mxu0 %v2796_v6  ;;  %2180 = vmatprep.subr.bf16.mxu1 %v2799_v7  ;;  %v2847_v6 = vld [vmem:[#allocation8 + $0x384] ss:$8 sps:$4 sm:$0xff]   ;;  %v2842_v7 = vld [vmem:[#allocation8 + $0x280] ss:$8 sps:$4 sm:$0xff]  }
 0x19d   : > { %v1131_v20 = vpop.f32.mrb[0].mxu0  ;;  %v1172_v13 = vpop.f32.mrb[0].mxu1 }
 0x19e   : > { %v1132_v21 = vadd.f32 %v1131_v20, %v420_v16  ;;  %v1133_v22 = vpop.f32.mrb[1].mxu0  ;;  %v1173_v23 = vadd.f32 %v1172_v13, %v428_v17  ;;  %v1174_v25 = vpop.f32.mrb[1].mxu1  ;;  %v2848_v16 = vld [vmem:[#allocation8 + $0x290] ss:$8 sps:$4 sm:$0xff]   ;;  %v2854_v20 = vld [vmem:[#allocation8 + $0x2a0] ss:$8 sps:$4 sm:$0xff]  }
 0x19f   : > { %v1134_v24 = vadd.f32 %v1133_v22, %v424_v18  ;;  %v1135_v26 = vpop.f32.mrb[2].mxu0  ;;  %v1175_v28 = vadd.f32 %v1174_v25, %v432_v19  ;;  %v1176_v29 = vpop.f32.mrb[2].mxu1  ;;  %v2851_v17 = vld [vmem:[#allocation8 + $0x390] ss:$8 sps:$4 sm:$0xff]   ;;  %v2856_v18 = vld [vmem:[#allocation8 + $0x2a4] ss:$8 sps:$4 sm:$0xff]  }
 0x1a0   : > { %v1261_v27 = vmax.f32 %v1132_v21, 0.0  ;;  %v1136_v30 = vpop.f32.mrb[3].mxu0  ;;  %v1263_v31 = vmax.f32 %v1173_v23, 0.0  ;;  %v1177_v33 = vpop.f32.mrb[3].mxu1  ;;  %v2859_v19 = vld [vmem:[#allocation8 + $0x3a4] ss:$8 sps:$4 sm:$0xff]  }
 0x1a1   : > { %v1262_v32 = vmax.f32 %v1134_v24, 0.0  ;;  %v1264_v35 = vmax.f32 %v1175_v28, 0.0  ;;  %v2857_v21 = vld [vmem:[#allocation8 + $0x3a0] ss:$8 sps:$4 sm:$0xff]   ;;  %v2862_v13 = vld [vmem:[#allocation8 + $0x2b4] ss:$8 sps:$4 sm:$0xff]  }
 0x1a2   : > { %v1269_v34 = vpack.c.bf16 %v1261_v27, %v1261_v27  ;;  %v1271_v36 = vpack.c.bf16 %v1263_v31, %v1263_v31  ;;  %v2865_v22 = vld [vmem:[#allocation8 + $0x3b4] ss:$8 sps:$4 sm:$0xff]   ;;  %v2860_v23 = vld [vmem:[#allocation8 + $0x2b0] ss:$8 sps:$4 sm:$0xff]   ;;  %v2868_v25 = vld [vmem:[#allocation8 + $0x2c4] ss:$8 sps:$4 sm:$0xff]  }
 0x1a3   : > { %v1270_v37 = vpack.c.bf16 %v1262_v32, %v1262_v32  ;;  %v1272_v39 = vpack.c.bf16 %v1264_v35, %v1264_v35  ;;  %v2863_v24 = vld [vmem:[#allocation8 + $0x3b0] ss:$8 sps:$4 sm:$0xff]   ;;  %v2871_v26 = vld [vmem:[#allocation8 + $0x3c4] ss:$8 sps:$4 sm:$0xff]   ;;  %v2866_v27 = vld [vmem:[#allocation8 + $0x2c0] ss:$8 sps:$4 sm:$0xff]  }
 0x1a4   : > { %v2869_v28 = vld [vmem:[#allocation8 + $0x3c0] ss:$8 sps:$4 sm:$0xff]   ;;  %v2874_v29 = vld [vmem:[#allocation8 + $0x2d4] ss:$8 sps:$4 sm:$0xff]   ;;  %v435_v31 = vsub.s32 4, %v3345_v9  ;;  %v443_v33 = vsub.s32 6, %v3345_v9 }
 0x1a5   : > { %2089 = vmatprep.mubr.bf16.mxu0 %v1270_v37  ;;  %2130 = vmatprep.mubr.bf16.mxu1 %v1272_v39  ;;  %v2877_v30 = vld [vmem:[#allocation8 + $0x3d4] ss:$8 sps:$4 sm:$0xff]   ;;  %v2872_v32 = vld [vmem:[#allocation8 + $0x2d0] ss:$8 sps:$4 sm:$0xff]   ;;  %v2880_v37 = vld [vmem:[#allocation8 + $0x2e4] ss:$8 sps:$4 sm:$0xff]  }
 0x1a6   : > { %2090 = vmatmul.mubr.bf16.vlgmr.msra.gmra.mrb[8].mxu0 %v1269_v34  ;;  %2131 = vmatmul.mubr.bf16.vlgmr.msra.gmra.mrb[8].mxu1 %v1271_v36  ;;  %v439_v34 = vsub.s32 5, %v3345_v9  ;;  %v2875_v35 = vld [vmem:[#allocation8 + $0x3d0] ss:$8 sps:$4 sm:$0xff]   ;;  %v447_v36 = vsub.s32 7, %v3345_v9  ;;  %v436_v39 = vrot.slane %v3348_v11, %v435_v31 }
 0x1a7   : > { %2140 = vmatpush1.bf16.msra.mxu0 %v2794_v38  ;;  %2181 = vmatpush1.bf16.msra.mxu1 %v2797_v40  ;;  %v2883_v38 = vld [vmem:[#allocation8 + $0x3e4] ss:$8 sps:$4 sm:$0xff]   ;;  %v444_v40 = vrot.slane %v3348_v11, %v443_v33 }
 0x1a8   : > { %2141 = vmatprep.subr.bf16.mxu0 %v2802_v41  ;;  %2182 = vmatprep.subr.bf16.mxu1 %v2805_v42  ;;  %v440_v41 = vrot.slane %v3348_v11, %v439_v34  ;;  %v2878_v42 = vld [vmem:[#allocation8 + $0x2e0] ss:$8 sps:$4 sm:$0xff]  }
 0x1a9   : > { %v2891_v34 = vld [vmem:[%s3317_s23 + $0x8] sm:$0xff] }
 0x1ab   : > { %2142 = vmatpush1.bf16.msra.mxu0 %v2800_v57  ;;  %2183 = vmatpush1.bf16.msra.mxu1 %v2803_v43  ;;  %v448_v57 = vrot.slane %v3348_v11, %v447_v36  ;;  %v2881_v43 = vld [vmem:[#allocation8 + $0x3e0] ss:$8 sps:$4 sm:$0xff]  }
 0x1ac   : > { %2143 = vmatprep.subr.bf16.mxu0 %v2808_v44  ;;  %2184 = vmatprep.subr.bf16.mxu1 %v2811_v45  ;;  %v2886_v44 = vld [vmem:[#allocation8 + $0x2f4] ss:$8 sps:$4 sm:$0xff]  }
 0x1af   : > { %2144 = vmatpush1.bf16.msra.mxu0 %v2806_v46  ;;  %2185 = vmatpush1.bf16.msra.mxu1 %v2809_v47  ;;  %v2889_v46 = vld [vmem:[#allocation8 + $0x3f4] ss:$8 sps:$4 sm:$0xff]  }
 0x1b0   : > { %2145 = vmatprep.subr.bf16.mxu0 %v2814_v48  ;;  %2186 = vmatprep.subr.bf16.mxu1 %v2817_v49 }
 0x1b3   : > { %2146 = vmatpush1.bf16.msra.mxu0 %v2812_v50  ;;  %2187 = vmatpush1.bf16.msra.mxu1 %v2815_v51 }
 0x1b4   : > { %2147 = vmatprep.subr.bf16.mxu0 %v2820_v52  ;;  %2188 = vmatprep.subr.bf16.mxu1 %v2823_v53 }
 0x1b7   : > { %2148 = vmatpush1.bf16.msra.mxu0 %v2818_v54  ;;  %2189 = vmatpush1.bf16.msra.mxu1 %v2821_v55  ;;  %v2884_v54 = vld [vmem:[#allocation8 + $0x2f0] ss:$8 sps:$4 sm:$0xff]  }
 0x1b8   : > { %2149 = vmatprep.subr.bf16.mxu0 %v2826_v56  ;;  %2190 = vmatprep.subr.bf16.mxu1 %v2829_v58 }
 0x1bb   : > { %2150 = vmatpush1.bf16.msra.mxu0 %v2824_v59  ;;  %2191 = vmatpush1.bf16.msra.mxu1 %v2827_v60  ;;  %v2887_v59 = vld [vmem:[#allocation8 + $0x3f0] ss:$8 sps:$4 sm:$0xff]  }
 0x1bc   : > { %2151 = vmatprep.subr.bf16.mxu0 %v2832_v61  ;;  %2192 = vmatprep.subr.bf16.mxu1 %v2835_v62 }
 0x1bf   : > { %2152 = vmatpush1.bf16.msra.mxu0 %v2830_v63  ;;  %2193 = vmatpush1.bf16.msra.mxu1 %v2833_v0 }
 0x1c0   : > { %2153 = vmatprep.subr.bf16.mxu0 %v2838_v1  ;;  %2194 = vmatprep.subr.bf16.mxu1 %v2841_v2 }
 0x1c3   : > { %2154 = vmatpush1.bf16.msra.mxu0 %v2836_v3  ;;  %2195 = vmatpush1.bf16.msra.mxu1 %v2839_v4  ;;  %v1405_v4 = vld [vmem:[%s3432_s4] sm:$0x3] }
 0x1c4   : > { %2155 = vmatprep.subr.bf16.mxu0 %v2844_v5  ;;  %2196 = vmatprep.subr.bf16.mxu1 %v2847_v6  ;;  %v1410_v5 = vrot.slane %v1405_v4, %v419_v10  ;;  %v1414_v6 = vrot.slane %v1405_v4, %v423_v14 }
 0x1c7   : > { %2156 = vmatpush1.bf16.msra.mxu0 %v2842_v7  ;;  %2197 = vmatpush1.bf16.msra.mxu1 %v2845_v8 }
 0x1c8   : > { %2157 = vmatprep.subr.bf16.mxu0 %v2850_v12  ;;  %2198 = vmatprep.subr.bf16.mxu1 %v2853_v15 }
 0x1cb   : > { %2158 = vmatpush1.bf16.msra.mxu0 %v2848_v16  ;;  %2199 = vmatpush1.bf16.msra.mxu1 %v2851_v17 }
 0x1cc   : > { %2159 = vmatprep.subr.bf16.mxu0 %v2856_v18  ;;  %2200 = vmatprep.subr.bf16.mxu1 %v2859_v19 }
 0x1cf   : > { %2160 = vmatpush1.bf16.msra.mxu0 %v2854_v20  ;;  %2201 = vmatpush1.bf16.msra.mxu1 %v2857_v21 }
 0x1d0   : > { %2161 = vmatprep.subr.bf16.mxu0 %v2862_v13  ;;  %2202 = vmatprep.subr.bf16.mxu1 %v2865_v22 }
 0x1d3   : > { %2162 = vmatpush1.bf16.msra.mxu0 %v2860_v23  ;;  %2203 = vmatpush1.bf16.msra.mxu1 %v2863_v24 }
 0x1d4   : > { %2163 = vmatprep.subr.bf16.mxu0 %v2868_v25  ;;  %2204 = vmatprep.subr.bf16.mxu1 %v2871_v26 }
 0x1d7   : > { %2164 = vmatpush1.bf16.msra.mxu0 %v2866_v27  ;;  %2205 = vmatpush1.bf16.msra.mxu1 %v2869_v28 }
 0x1d8   : > { %2165 = vmatprep.subr.bf16.mxu0 %v2874_v29  ;;  %2206 = vmatprep.subr.bf16.mxu1 %v2877_v30 }
 0x1db   : > { %2166 = vmatpush1.bf16.msra.mxu0 %v2872_v32  ;;  %2207 = vmatpush1.bf16.msra.mxu1 %v2875_v35  ;;  %v2890_v32 = vld [vmem:[%s3317_s23] sm:$0xff] }
 0x1dc   : > { %2167 = vmatprep.subr.bf16.mxu0 %v2880_v37  ;;  %2208 = vmatprep.subr.bf16.mxu1 %v2883_v38 }
 0x1dd   : > { %v1213_v45 = vpop.f32.mrb[4].mxu0  ;;  %v1254_v48 = vpop.f32.mrb[4].mxu1 }
 0x1de   : > { %v1214_v47 = vadd.f32 %v1213_v45, %v436_v39  ;;  %v1215_v49 = vpop.f32.mrb[5].mxu0  ;;  %v1255_v50 = vadd.f32 %v1254_v48, %v444_v40  ;;  %v1256_v52 = vpop.f32.mrb[5].mxu1 }
 0x1df   : > { %v1216_v51 = vadd.f32 %v1215_v49, %v440_v41  ;;  %v1217_v53 = vpop.f32.mrb[6].mxu0  ;;  %2168 = vmatpush1.bf16.msra.mxu0 %v2878_v42  ;;  %v1257_v56 = vadd.f32 %v1256_v52, %v448_v57  ;;  %v1258_v58 = vpop.f32.mrb[6].mxu1  ;;  %2209 = vmatpush1.bf16.msra.mxu1 %v2881_v43 }
 0x1e0   : > { %v1265_v55 = vmax.f32 %v1214_v47, 0.0  ;;  %v1218_v11 = vpop.f32.mrb[7].mxu0  ;;  %2169 = vmatprep.subr.bf16.mxu0 %v2886_v44  ;;  %v1267_v60 = vmax.f32 %v1255_v50, 0.0  ;;  %v1259_v62 = vpop.f32.mrb[7].mxu1  ;;  %2210 = vmatprep.subr.bf16.mxu1 %v2889_v46 }
 0x1e1   : > { %v1266_v61 = vmax.f32 %v1216_v51, 0.0  ;;  %v1268_v63 = vmax.f32 %v1257_v56, 0.0 }
 0x1e2   : > { %v1275_v0 = vpack.c.bf16 %v1267_v60, %v1267_v60  ;;  %v1273_v2 = vpack.c.bf16 %v1265_v55, %v1265_v55 }
 0x1e3   : > { %v1274_v1 = vpack.c.bf16 %v1266_v61, %v1266_v61  ;;  %2170 = vmatpush1.bf16.msra.mxu0 %v2884_v54  ;;  %v1276_v3 = vpack.c.bf16 %v1268_v63, %v1268_v63  ;;  %2211 = vmatpush1.bf16.msra.mxu1 %v2887_v59 }
 0x1e5   : > { %2171 = vmatprep.mubr.bf16.mxu0 %v1274_v1  ;;  %2212 = vmatprep.mubr.bf16.mxu1 %v1276_v3 }
 0x1e6   : > { %2172 = vmatmul.mubr.bf16.vlgmr.msra.gmra.mrb[12].mxu0 %v1273_v2  ;;  %2213 = vmatmul.mubr.bf16.vlgmr.msra.gmra.mrb[12].mxu1 %v1275_v0 }
 0x279   : > { %v2091_v7 = vpop.f32.mrb[8].mxu0  ;;  %v2132_v12 = vpop.f32.mrb[8].mxu1 }
 0x27a   : > { %v2092_v8 = vadd.f32 %v2091_v7, %v1410_v5  ;;  %v2093_v15 = vpop.f32.mrb[9].mxu0  ;;  %v2134_v17 = vpop.f32.mrb[9].mxu1 }
 0x27b   : > { %v2094_v16 = vadd.f32 %v2093_v15, %v1414_v6  ;;  %v2095_v18 = vpop.f32.mrb[10].mxu0  ;;  %v2136_v20 = vpop.f32.mrb[10].mxu1 }
 0x27c   : > { %v2133_v19 = vadd.f32 %v2132_v12, %v2092_v8  ;;  %v2096_v21 = vpop.f32.mrb[11].mxu0  ;;  %v2137_v22 = vpop.f32.mrb[11].mxu1 }
 0x27d   : > { %v2135_v13 = vadd.f32 %v2134_v17, %v2094_v16 }
 0x2b9   : > { %v2173_v23 = vpop.f32.mrb[12].mxu0  ;;  %v2214_v9 = vpop.f32.mrb[12].mxu1 }
 0x2ba   : > { %v2174_v10 = vadd.f32 %v2173_v23, %v2133_v19  ;;  %v2175_v14 = vpop.f32.mrb[13].mxu0  ;;  %v2216_v25 = vpop.f32.mrb[13].mxu1 }
 0x2bb   : > { %v2176_v24 = vadd.f32 %v2175_v14, %v2135_v13  ;;  %v2177_v26 = vpop.f32.mrb[14].mxu0  ;;  %v2218_v28 = vpop.f32.mrb[14].mxu1 }
 0x2bc   : > { %v2215_v27 = vadd.f32 %v2214_v9, %v2174_v10  ;;  %v2178_v29 = vpop.f32.mrb[15].mxu0  ;;  %v2219_v31 = vpop.f32.mrb[15].mxu1 }
 0x2bd   : > { %v2217_v30 = vadd.f32 %v2216_v25, %v2176_v24 }
 0x2be   : > { %v2221_v33 = vadd.f32 %v2890_v32, %v2215_v27 }
 0x2bf   : > { %v2222_v35 = vadd.f32 %v2891_v34, %v2217_v30 }
 0x2c0   : > { %2223 = vst [vmem:[%s282_s13] sm:$0xff] %v2221_v33 }
 0x2c1   : > { %2224 = vst [vmem:[%s282_s13 + $0x8] sm:$0xff] %v2222_v35 }
 0x2c2   : > { %3019 = shalt.err (!%p3016_p4)
}
 0x2c3   : > { %s3020_s15 = scalar_lea.hbm %s3384_s8, 256  ;;  %s3024_s23 = scalar_lea.hbm %s3433_s5, 512 }
 0x2c4   : > { %p3021_p0 = scmp.ne.s32.totalorder %s3384_s8, %s3020_s15  ;;  %p3025_p8 = scmp.lt.u32.totalorder %s3384_s8, %s3433_s5 }
 0x2c5   : > { %p3026_p13 = scmp.lt.u32.totalorder %s3024_s23, %s3020_s15  ;;  %p3028_p10 = scmp.lt.u32.totalorder %s3020_s15, %s3384_s8 }
 0x2c6   : > { %p3022_p9 = pnand %p3021_p0, %p3266_p5 }
 0x2c7   : > { %p3027_p6 = por %p3026_p13, %p3025_p8 }
 0x2c8   : > { %p3023_p11 = pneg %p3022_p9 }
 0x2c9   : > { %p3029_p3 = por %p3028_p10, %p3027_p6 }
 0x2cb   : > { %p3030_p7 = pnand %p3029_p3, %p3023_p11 }
 0x2cd   : > { %3033 = shalt.err (!%p3030_p7)
}
 0x2ce   : > { %2631 = dma.vmem_to_hbm [thread:$0]  (%p3266_p5), %s3386_s6, 256, %s3384_s8, %s2226_s22  }
 0x2cf PF: > { %s2252_s11 = sand.u32 1, %s3068_s18   ;;  %p3451_p12 = scmp.ne.s32.totalorder %s3438_s25, 0 }
 0x2d0   : > { %p3452_p2 = scmp.ge.s32.totalorder %s3080_s21, 2  ;;  %s2253_s13 = scalar_lea.sflag [#allocation4], %s2252_s11 }
 0x2d2   : > { %p2648_p1 = pnand %p3452_p2, %p3451_p12 }
 0x2d4   : > { %3063 = dma.done.wait (!%p2648_p1), %s2253_s13, 256  }
 0x2d5   : > { %3065 = vsyncadd (!%p2648_p1), %s2253_s13, 4294967040  ;;  %p20_p4 = scmp.ge.s32.totalorder %s3252_s28, 4   ;;  %s3453_s18 = smov %s3072_s19 }
 0x2d6   : > { %s3454_s19 = smov %s3076_s20  ;;  %s3455_s20 = smov %s3262_s27 }
 0x2d7   : > { %s3456_s21 = smov %s3252_s28  ;;  %22 = sbr.rel (!%p20_p4) target bundleno = 7 (0x7), region = 97 }
 0x2de   :  { %2258 = vsyncpa [#allocation3], 1 }
 0x2df   :  { %2260 = vsyncpa [#allocation3 + $0x1], 1 }
 0x2e0   :  { %2261 = vsyncpa [#allocation6], 1 }
 0x2e1   :  { %2262 = vsyncpa [#allocation9], 1 }
 0x2e2   :  { %2263 = vsyncpa [#allocation4], 1 }
 0x2e3   :  { %2265 = vsyncpa [#allocation4 + $0x1], 1 }

</bundles_post_ra>
